<compile_context>
chip_gen: v5e
topology: v5e:2x2
jax: 0.10.0
libtpu: 0.0.40
codegen_flags: <defaults>
</compile_context>

<pallas_src>
import functools

import jax
import jax.numpy as jnp
from jax.experimental import pallas as pl
from jax.experimental.pallas import tpu as pltpu


def _round_up(x, m):
    return ((x + m - 1) // m) * m


def _auto_tb(B, *, min_steps=6, max_tb=512):
    # >= min_steps grid steps so BlockSpec pipelining always has a next/prev
    # step to overlap the x-tile DMA / output writeback with, and so v7x's two
    # TensorCores each get >=3 steps when the batch axis is sharded. Capped at
    # 512 rows so very large batches still amortize the ~0.35us/step overhead
    # with >=256 KB x-tile DMAs.
    tb = _round_up(max(1, pl.cdiv(B, min_steps)), 8)
    return min(tb, max_tb)


def _normalize(h, eps=1e-5):
    # Two-pass (centered) LayerNorm core; affine applied by the caller.
    mu = jnp.mean(h, axis=-1, keepdims=True)
    c = h - mu
    var = jnp.mean(c * c, axis=-1, keepdims=True)
    return c * jax.lax.rsqrt(var + eps)


def output_encoder_kernel(h1, h2, n_out, x_ref, w1_ref, w2_ref, w3_ref,
                          vec_ref, o_ref):
    """Fused LN -> Linear -> LN+ReLU -> Linear -> LN+ReLU -> Linear.

    vec_ref rows (lane-padded): 0:b1' 1:g1 2:bb1 3:b2 4:g2 5:bb2 6:b3.
    """
    x = x_ref[...].astype(jnp.float32)

    # Static ref slices (free) carve the packed vector operand.
    b1 = vec_ref[0:1, :h1]
    g1 = vec_ref[1:2, :h1]
    bb1 = vec_ref[2:3, :h1]
    b2 = vec_ref[3:4, :h2]
    g2 = vec_ref[4:5, :h2]
    bb2 = vec_ref[5:6, :h2]
    b3 = vec_ref[6:7, :n_out]

    # norm_layer_in: its gamma/beta were folded into w1/b1 at wrapper time.
    h = _normalize(x)
    # linear1 (f32 operands, f32 accumulation)
    h = jnp.dot(h, w1_ref[...], preferred_element_type=jnp.float32) + b1
    # norm_layer1 + ReLU (affine kept here: ReLU blocks folding into w2).
    h = jnp.maximum(_normalize(h) * g1 + bb1, 0.0)
    # dropout(p=0.0) -> identity; linear2
    h = jnp.dot(h, w2_ref[...], preferred_element_type=jnp.float32) + b2
    # norm_layer2 + ReLU
    h = jnp.maximum(_normalize(h) * g2 + bb2, 0.0)
    # output projection
    h = jnp.dot(h, w3_ref[...], preferred_element_type=jnp.float32) + b3

    o_ref[...] = h.astype(o_ref.dtype)


def output_encoder(x, params, *, tb=None):
    """x: [B, input_dim] (f32 or bf16). params: dict (see init_params)."""
    B, D = x.shape
    H1 = params["w1"].shape[1]
    H2 = params["w2"].shape[1]
    OUT = params["w3"].shape[1]

    # ---- fold LN_in affine into linear1 (exact: no nonlinearity between):
    #      (xhat*g + b) @ W1 + b1 == xhat @ (g[:,None]*W1) + (b @ W1 + b1)
    w1 = params["w1"].astype(jnp.float32)
    w1f = params["g_in"].reshape(D, 1).astype(jnp.float32) * w1
    b1f = (params["b_in"].reshape(1, D).astype(jnp.float32) @ w1
           + params["b1"].reshape(1, H1).astype(jnp.float32))
    w2 = params["w2"].astype(jnp.float32)
    w3 = params["w3"].astype(jnp.float32)

    # ---- pack the 7 remaining (1, H) vectors into one (7, VW) operand.
    VW = _round_up(max(H1, H2, OUT), 128)

    def _row(v):
        v = v.reshape(1, -1).astype(jnp.float32)
        return jnp.pad(v, ((0, 0), (0, VW - v.shape[1])))

    vecs = jnp.concatenate(
        [_row(b1f), _row(params["g1"]), _row(params["bb1"]),
         _row(params["b2"]), _row(params["g2"]), _row(params["bb2"]),
         _row(params["b3"])], axis=0)              # (7, VW) f32

    # ---- batch tiling: zero-pad so the grid divides evenly.
    if tb is None:
        tb = _auto_tb(B)
    tb = max(8, min(_round_up(tb, 8), _round_up(B, 8)))
    Bp = _round_up(B, tb)
    if Bp != B:
        x = jnp.pad(x, ((0, Bp - B), (0, 0)))
    grid = (Bp // tb,)

    def const_spec(shape):
        return pl.BlockSpec(shape, lambda i: tuple(0 for _ in shape))

    in_specs = [
        pl.BlockSpec((tb, D), lambda i: (i, 0)),   # x tiled over batch
        const_spec((D, H1)),                       # w1 (LN_in-folded)
        const_spec((H1, H2)),                      # w2
        const_spec((H2, OUT)),                     # w3
        const_spec((7, VW)),                       # packed biases / LN affines
    ]
    # OUT stays un-padded: padding to 128 lanes would inflate output HBM
    # writeback 8x on a memory-bound kernel for a few masked vst per tile.
    out_spec = pl.BlockSpec((tb, OUT), lambda i: (i, 0))

    # Advisory cost estimate (kernel is HBM / overhead bound at these sizes).
    flops = 2 * Bp * (D * H1 + H1 * H2 + H2 * OUT) + 12 * Bp * (D + H1 + H2)
    bytes_accessed = (x.dtype.itemsize * Bp * D + 4 * Bp * OUT
                      + 4 * (D * H1 + H1 * H2 + H2 * OUT) + 4 * 7 * VW)
    cost = pl.CostEstimate(flops=int(flops), transcendentals=int(3 * Bp),
                           bytes_accessed=int(bytes_accessed))

    kernel = functools.partial(output_encoder_kernel, H1, H2, OUT)

    out = pl.pallas_call(
        kernel,
        out_shape=jax.ShapeDtypeStruct((Bp, OUT), jnp.float32),
        grid_spec=pltpu.PrefetchScalarGridSpec(
            num_scalar_prefetch=0,
            grid=grid,
            in_specs=in_specs,
            out_specs=out_spec,
        ),
        compiler_params=pltpu.CompilerParams(
            dimension_semantics=("parallel",),
        ),
        cost_estimate=cost,
    )(x, w1f, w2, w3, vecs)
    return out[:B]


def init_params(key, input_dim, output_dim):
    """Synthetic parameters matching OutputEncoder.__init__ shapes.

    LN gammas/betas are given non-trivial values so the affine-fold path is
    actually exercised (torch defaults to gamma=1, beta=0).
    """
    h1, h2 = input_dim // 2, input_dim // 4
    ks = jax.random.split(key, 6)

    def linear(k, fan_in, fan_out):
        bound = 1.0 / jnp.sqrt(fan_in)
        kw, kb = jax.random.split(k)
        w = jax.random.uniform(kw, (fan_in, fan_out), jnp.float32, -bound, bound)
        b = jax.random.uniform(kb, (1, fan_out), jnp.float32, -bound, bound)
        return w, b

    def ln(k, dim):
        kg, kb = jax.random.split(k)
        g = 1.0 + 0.1 * jax.random.normal(kg, (1, dim), jnp.float32)
        b = 0.05 * jax.random.normal(kb, (1, dim), jnp.float32)
        return g, b

    w1, b1 = linear(ks[0], input_dim, h1)
    w2, b2 = linear(ks[1], h1, h2)
    w3, b3 = linear(ks[2], h2, output_dim)
    g_in, b_in = ln(ks[3], input_dim)
    g1, bb1 = ln(ks[4], h1)
    g2, bb2 = ln(ks[5], h2)

    return {"g_in": g_in, "b_in": b_in,
            "w1": w1, "b1": b1, "g1": g1, "bb1": bb1,
            "w2": w2, "b2": b2, "g2": g2, "bb2": bb2,
            "w3": w3, "b3": b3}


def reference_forward(x, p, eps=1e-5):
    """Pure-JAX (f32) reference of OutputEncoder.forward (dropout -> identity)."""
    x = x.astype(jnp.float32)

    def ln(h, g, b):
        mu = jnp.mean(h, axis=-1, keepdims=True)
        var = jnp.mean((h - mu) ** 2, axis=-1, keepdims=True)
        return (h - mu) / jnp.sqrt(var + eps) * g + b

    h = ln(x, p["g_in"], p["b_in"])
    h = h @ p["w1"] + p["b1"]
    h = jnp.maximum(ln(h, p["g1"], p["bb1"]), 0.0)
    h = h @ p["w2"] + p["b2"]
    h = jnp.maximum(ln(h, p["g2"], p["bb2"]), 0.0)
    return h @ p["w3"] + p["b3"]


if __name__ == "__main__":
    key = jax.random.PRNGKey(0)
    kx, kp = jax.random.split(key)

    INPUT_DIM, OUTPUT_DIM = 128, 16
    params = init_params(kp, INPUT_DIM, OUTPUT_DIM)

    # (1) f32, B=512 -> tb=88, 6 grid steps (>=3 per v7x TensorCore); parity
    #     with the PyTorch-equivalent reference (LN_in affine fold is exact).
    B1 = 512
    x1 = jax.random.normal(kx, (B1, INPUT_DIM), jnp.float32)
    out1 = jax.block_until_ready(output_encoder(x1, params))
    ref1 = reference_forward(x1, params)
    assert out1.shape == (B1, OUTPUT_DIM)
    assert jnp.allclose(out1, ref1, atol=1e-4, rtol=1e-4), "f32 mismatch vs reference"

    # (2) ragged batch: exercises zero-padding + non-dividing grid.
    B2 = 37
    x2 = jax.random.normal(jax.random.PRNGKey(1), (B2, INPUT_DIM), jnp.float32)
    out2 = jax.block_until_ready(output_encoder(x2, params))
    ref2 = reference_forward(x2, params)
    assert out2.shape == (B2, OUTPUT_DIM)
    assert jnp.allclose(out2, ref2, atol=1e-4, rtol=1e-4), "ragged mismatch vs reference"

    # (3) bf16 activations at the call boundary (halves the dominant x HBM
    #     stream); LN/matmul math stays f32 in-kernel. Validated against the
    #     TRUE f32 reference with a bf16-input tolerance.
    B3 = 256
    x3 = jax.random.normal(jax.random.PRNGKey(2), (B3, INPUT_DIM), jnp.float32)
    out3 = jax.block_until_ready(output_encoder(x3.astype(jnp.bfloat16), params))
    ref3 = reference_forward(x3, params)
    assert out3.shape == (B3, OUTPUT_DIM)
    assert jnp.allclose(out3, ref3, atol=3e-2, rtol=3e-2), "bf16-input mismatch vs f32 reference"

    print("KERNEL_OK")
</pallas_src>

<mosaic_0001>
module attributes {stable_mosaic.version = 11 : i64} {
  func.func @output_encoder_kernel(%arg0: i32, %arg1: memref<88x128xf32, #tpu.memory_space<vmem>>, %arg2: memref<128x64xf32, #tpu.memory_space<vmem>>, %arg3: memref<64x32xf32, #tpu.memory_space<vmem>>, %arg4: memref<32x16xf32, #tpu.memory_space<vmem>>, %arg5: memref<7x128xf32, #tpu.memory_space<vmem>>, %arg6: memref<88x16xf32, #tpu.memory_space<vmem>>) attributes {dimension_semantics = [#tpu.dimension_semantics<parallel>], iteration_bounds = array<i64: 6>, scalar_prefetch = 0 : i64, scratch_operands = 0 : i64, tpu.core_type = #tpu.core_type<tc>, window_params = [{transform_indices = @transform_0, window_bounds = array<i64: 88, 128>}, {pipeline_mode = #tpu.pipeline_mode<synchronous>, transform_indices = @transform_1, window_bounds = array<i64: 128, 64>}, {pipeline_mode = #tpu.pipeline_mode<synchronous>, transform_indices = @transform_2, window_bounds = array<i64: 64, 32>}, {pipeline_mode = #tpu.pipeline_mode<synchronous>, transform_indices = @transform_3, window_bounds = array<i64: 32, 16>}, {pipeline_mode = #tpu.pipeline_mode<synchronous>, transform_indices = @transform_4, window_bounds = array<i64: 7, 128>}, {transform_indices = @transform_5, window_bounds = array<i64: 88, 16>}]} {
    %c0 = arith.constant 0 : index
    %c0_0 = arith.constant 0 : index
    %0 = vector.load %arg1[%c0, %c0_0] : memref<88x128xf32, #tpu.memory_space<vmem>>, vector<88x128xf32>
    %c0_1 = arith.constant 0 : index
    %c0_2 = arith.constant 0 : index
    %1 = vector.load %arg5[%c0_1, %c0_2] : memref<7x128xf32, #tpu.memory_space<vmem>>, vector<1x64xf32>
    %c1 = arith.constant 1 : index
    %c0_3 = arith.constant 0 : index
    %2 = vector.load %arg5[%c1, %c0_3] : memref<7x128xf32, #tpu.memory_space<vmem>>, vector<1x64xf32>
    %c2 = arith.constant 2 : index
    %c0_4 = arith.constant 0 : index
    %3 = vector.load %arg5[%c2, %c0_4] : memref<7x128xf32, #tpu.memory_space<vmem>>, vector<1x64xf32>
    %c3 = arith.constant 3 : index
    %c0_5 = arith.constant 0 : index
    %4 = vector.load %arg5[%c3, %c0_5] : memref<7x128xf32, #tpu.memory_space<vmem>>, vector<1x32xf32>
    %c4 = arith.constant 4 : index
    %c0_6 = arith.constant 0 : index
    %5 = vector.load %arg5[%c4, %c0_6] : memref<7x128xf32, #tpu.memory_space<vmem>>, vector<1x32xf32>
    %c5 = arith.constant 5 : index
    %c0_7 = arith.constant 0 : index
    %6 = vector.load %arg5[%c5, %c0_7] : memref<7x128xf32, #tpu.memory_space<vmem>>, vector<1x32xf32>
    %c6 = arith.constant 6 : index
    %c0_8 = arith.constant 0 : index
    %7 = vector.load %arg5[%c6, %c0_8] : memref<7x128xf32, #tpu.memory_space<vmem>>, vector<1x16xf32>
    %cst = arith.constant dense<0.000000e+00> : vector<88xf32>
    %8 = vector.multi_reduction <add>, %0, %cst [1] : vector<88x128xf32> to vector<88xf32>
    %9 = vector.shape_cast %8 : vector<88xf32> to vector<88x1xf32>
    %cst_9 = arith.constant 1.280000e+02 : f32
    %10 = vector.broadcast %cst_9 : f32 to vector<88x1xf32>
    %11 = arith.divf %9, %10 : vector<88x1xf32>
    %12 = vector.broadcast %11 : vector<88x1xf32> to vector<88x128xf32>
    %13 = arith.subf %0, %12 : vector<88x128xf32>
    %14 = arith.mulf %13, %13 : vector<88x128xf32>
    %cst_10 = arith.constant dense<0.000000e+00> : vector<88xf32>
    %15 = vector.multi_reduction <add>, %14, %cst_10 [1] : vector<88x128xf32> to vector<88xf32>
    %16 = vector.shape_cast %15 : vector<88xf32> to vector<88x1xf32>
    %cst_11 = arith.constant 1.280000e+02 : f32
    %17 = vector.broadcast %cst_11 : f32 to vector<88x1xf32>
    %18 = arith.divf %16, %17 : vector<88x1xf32>
    %cst_12 = arith.constant 9.99999974E-6 : f32
    %19 = vector.broadcast %cst_12 : f32 to vector<88x1xf32>
    %20 = arith.addf %18, %19 : vector<88x1xf32>
    %21 = math.rsqrt %20 : vector<88x1xf32>
    %22 = vector.broadcast %21 : vector<88x1xf32> to vector<88x128xf32>
    %23 = arith.mulf %13, %22 : vector<88x128xf32>
    %c0_13 = arith.constant 0 : index
    %c0_14 = arith.constant 0 : index
    %24 = vector.load %arg2[%c0_13, %c0_14] : memref<128x64xf32, #tpu.memory_space<vmem>>, vector<128x64xf32>
    %cst_15 = arith.constant dense<0.000000e+00> : vector<88x64xf32>
    %25 = tpu.matmul %23, %24, %cst_15 {dimension_numbers = #tpu.dot_dimension_numbers<[1], [0], [0], [1], [0, 0, 1, 1], [], []>} : vector<88x128xf32>, vector<128x64xf32>, vector<88x64xf32> -> vector<88x64xf32>
    %26 = vector.broadcast %1 : vector<1x64xf32> to vector<88x64xf32>
    %27 = arith.addf %25, %26 : vector<88x64xf32>
    %cst_16 = arith.constant dense<0.000000e+00> : vector<88xf32>
    %28 = vector.multi_reduction <add>, %27, %cst_16 [1] : vector<88x64xf32> to vector<88xf32>
    %29 = vector.shape_cast %28 : vector<88xf32> to vector<88x1xf32>
    %cst_17 = arith.constant 6.400000e+01 : f32
    %30 = vector.broadcast %cst_17 : f32 to vector<88x1xf32>
    %31 = arith.divf %29, %30 : vector<88x1xf32>
    %32 = vector.broadcast %31 : vector<88x1xf32> to vector<88x64xf32>
    %33 = arith.subf %27, %32 : vector<88x64xf32>
    %34 = arith.mulf %33, %33 : vector<88x64xf32>
    %cst_18 = arith.constant dense<0.000000e+00> : vector<88xf32>
    %35 = vector.multi_reduction <add>, %34, %cst_18 [1] : vector<88x64xf32> to vector<88xf32>
    %36 = vector.shape_cast %35 : vector<88xf32> to vector<88x1xf32>
    %cst_19 = arith.constant 6.400000e+01 : f32
    %37 = vector.broadcast %cst_19 : f32 to vector<88x1xf32>
    %38 = arith.divf %36, %37 : vector<88x1xf32>
    %cst_20 = arith.constant 9.99999974E-6 : f32
    %39 = vector.broadcast %cst_20 : f32 to vector<88x1xf32>
    %40 = arith.addf %38, %39 : vector<88x1xf32>
    %41 = math.rsqrt %40 : vector<88x1xf32>
    %42 = vector.broadcast %41 : vector<88x1xf32> to vector<88x64xf32>
    %43 = arith.mulf %33, %42 : vector<88x64xf32>
    %44 = vector.broadcast %2 : vector<1x64xf32> to vector<88x64xf32>
    %45 = arith.mulf %43, %44 : vector<88x64xf32>
    %46 = vector.broadcast %3 : vector<1x64xf32> to vector<88x64xf32>
    %47 = arith.addf %45, %46 : vector<88x64xf32>
    %cst_21 = arith.constant 0.000000e+00 : f32
    %48 = vector.broadcast %cst_21 : f32 to vector<88x64xf32>
    %49 = arith.maximumf %47, %48 : vector<88x64xf32>
    %c0_22 = arith.constant 0 : index
    %c0_23 = arith.constant 0 : index
    %50 = vector.load %arg3[%c0_22, %c0_23] : memref<64x32xf32, #tpu.memory_space<vmem>>, vector<64x32xf32>
    %cst_24 = arith.constant dense<0.000000e+00> : vector<88x32xf32>
    %51 = tpu.matmul %49, %50, %cst_24 {dimension_numbers = #tpu.dot_dimension_numbers<[1], [0], [0], [1], [0, 0, 1, 1], [], []>} : vector<88x64xf32>, vector<64x32xf32>, vector<88x32xf32> -> vector<88x32xf32>
    %52 = vector.broadcast %4 : vector<1x32xf32> to vector<88x32xf32>
    %53 = arith.addf %51, %52 : vector<88x32xf32>
    %cst_25 = arith.constant dense<0.000000e+00> : vector<88xf32>
    %54 = vector.multi_reduction <add>, %53, %cst_25 [1] : vector<88x32xf32> to vector<88xf32>
    %55 = vector.shape_cast %54 : vector<88xf32> to vector<88x1xf32>
    %cst_26 = arith.constant 3.200000e+01 : f32
    %56 = vector.broadcast %cst_26 : f32 to vector<88x1xf32>
    %57 = arith.divf %55, %56 : vector<88x1xf32>
    %58 = vector.broadcast %57 : vector<88x1xf32> to vector<88x32xf32>
    %59 = arith.subf %53, %58 : vector<88x32xf32>
    %60 = arith.mulf %59, %59 : vector<88x32xf32>
    %cst_27 = arith.constant dense<0.000000e+00> : vector<88xf32>
    %61 = vector.multi_reduction <add>, %60, %cst_27 [1] : vector<88x32xf32> to vector<88xf32>
    %62 = vector.shape_cast %61 : vector<88xf32> to vector<88x1xf32>
    %cst_28 = arith.constant 3.200000e+01 : f32
    %63 = vector.broadcast %cst_28 : f32 to vector<88x1xf32>
    %64 = arith.divf %62, %63 : vector<88x1xf32>
    %cst_29 = arith.constant 9.99999974E-6 : f32
    %65 = vector.broadcast %cst_29 : f32 to vector<88x1xf32>
    %66 = arith.addf %64, %65 : vector<88x1xf32>
    %67 = math.rsqrt %66 : vector<88x1xf32>
    %68 = vector.broadcast %67 : vector<88x1xf32> to vector<88x32xf32>
    %69 = arith.mulf %59, %68 : vector<88x32xf32>
    %70 = vector.broadcast %5 : vector<1x32xf32> to vector<88x32xf32>
    %71 = arith.mulf %69, %70 : vector<88x32xf32>
    %72 = vector.broadcast %6 : vector<1x32xf32> to vector<88x32xf32>
    %73 = arith.addf %71, %72 : vector<88x32xf32>
    %cst_30 = arith.constant 0.000000e+00 : f32
    %74 = vector.broadcast %cst_30 : f32 to vector<88x32xf32>
    %75 = arith.maximumf %73, %74 : vector<88x32xf32>
    %c0_31 = arith.constant 0 : index
    %c0_32 = arith.constant 0 : index
    %76 = vector.load %arg4[%c0_31, %c0_32] : memref<32x16xf32, #tpu.memory_space<vmem>>, vector<32x16xf32>
    %cst_33 = arith.constant dense<0.000000e+00> : vector<88x16xf32>
    %77 = tpu.matmul %75, %76, %cst_33 {dimension_numbers = #tpu.dot_dimension_numbers<[1], [0], [0], [1], [0, 0, 1, 1], [], []>} : vector<88x32xf32>, vector<32x16xf32>, vector<88x16xf32> -> vector<88x16xf32>
    %78 = vector.broadcast %7 : vector<1x16xf32> to vector<88x16xf32>
    %79 = arith.addf %77, %78 : vector<88x16xf32>
    %c0_34 = arith.constant 0 : index
    %c0_35 = arith.constant 0 : index
    %80 = vector.load %arg6[%c0_34, %c0_35] : memref<88x16xf32, #tpu.memory_space<vmem>>, vector<88x16xf32>
    tpu.vector_store %arg6[%c0_34, %c0_35], %79 {strides = array<i32>} : memref<88x16xf32, #tpu.memory_space<vmem>>, vector<88x16xf32>,
    return
  }
  func.func @transform_0(%arg0: i32) -> (i32, i32) {
    %c0_i32 = arith.constant 0 : i32
    %c0_i32_0 = arith.constant 0 : i32
    return %arg0, %c0_i32 : i32, i32
  }
  func.func @transform_1(%arg0: i32) -> (i32, i32) {
    %c0_i32 = arith.constant 0 : i32
    %c0_i32_0 = arith.constant 0 : i32
    %c0_i32_1 = arith.constant 0 : i32
    return %c0_i32, %c0_i32_0 : i32, i32
  }
  func.func @transform_2(%arg0: i32) -> (i32, i32) {
    %c0_i32 = arith.constant 0 : i32
    %c0_i32_0 = arith.constant 0 : i32
    %c0_i32_1 = arith.constant 0 : i32
    return %c0_i32, %c0_i32_0 : i32, i32
  }
  func.func @transform_3(%arg0: i32) -> (i32, i32) {
    %c0_i32 = arith.constant 0 : i32
    %c0_i32_0 = arith.constant 0 : i32
    %c0_i32_1 = arith.constant 0 : i32
    return %c0_i32, %c0_i32_0 : i32, i32
  }
  func.func @transform_4(%arg0: i32) -> (i32, i32) {
    %c0_i32 = arith.constant 0 : i32
    %c0_i32_0 = arith.constant 0 : i32
    %c0_i32_1 = arith.constant 0 : i32
    return %c0_i32, %c0_i32_0 : i32, i32
  }
  func.func @transform_5(%arg0: i32) -> (i32, i32) {
    %c0_i32 = arith.constant 0 : i32
    %c0_i32_0 = arith.constant 0 : i32
    return %arg0, %c0_i32 : i32, i32
  }
}

</mosaic_0001>

<bundles_post_ra>
// kernel: tpu_custom_call.1
= control target key start
LH: loop header
LB: loop body
LE: loop exit
PB: predicated region body
PF: predicated region fallthrough
CT: control target
= control target key end

     0   :  { %10 = vsyncpa [#allocation3], 0  ;;  %s2410_s0 = inlined_call_operand.hbm [shape: f32[528,128], index: 0, kind: input, shape index: {}]   ;;  %s2411_s1 = inlined_call_operand.vmem [shape: f32[128,64], index: 1, kind: input, shape index: {}]   ;;  %s2412_s2 = inlined_call_operand.vmem [shape: f32[64,32], index: 2, kind: input, shape index: {}]   ;;  %s2413_s3 = inlined_call_operand.vmem [shape: f32[32,16], index: 3, kind: input, shape index: {}]   ;;  %s2414_s4 = inlined_call_operand.vmem [shape: f32[7,128], index: 4, kind: input, shape index: {}]   ;;  %s2415_s5 = inlined_call_operand.vmem [shape: f32[528,16], index: 5, kind: output, shape index: {}]  }
   0x1   :  { %12 = vsyncpa [#allocation3 + $0x1], 0  ;;  %s1676_s18 = smov 0   ;;  %s1678_s19 = smov 0  }
   0x2   :  { %s1680_s20 = smov 0   ;;  %s1682_s21 = smov 0  }
   0x3 LB: > { %s1390_s22 = sadd.s32 4294967295, %s1639_s21   ;;  %s1696_s23 = sadd.s32 1, %s1639_s21   ;;  %s1639_s21 = sphi %s1682_s21, %s2427_s21   ;;  %s1635_s20 = sphi %s1680_s20, %s2426_s20   ;;  %s1631_s19 = sphi %s1678_s19, %s2425_s19   ;;  %s1627_s18 = sphi %s1676_s18, %s2424_s18  }
   0x4   : > { %s22_s24 = ssub.s32 %s1639_s21, %s1696_s23  ;;  %s25_s25 = sadd.s32 1, %s1635_s20 }
   0x5   : > { %p23_p0 = scmp.eq.s32.totalorder %s22_s24, 0  ;;  %p32_p1 = scmp.ne.s32.totalorder %s1635_s20, %s1631_s19 }
   0x6   : > { %p33_p2 = scmp.eq.s32.totalorder %s1639_s21, 0  ;;  %p38_p3 = scmp.ne.s32.totalorder %s1631_s19, %s1627_s18 }
   0x7   : > { %s1706_s26 = scalar_select %p23_p0, %s1635_s20, %s25_s25  }
   0x8   : > { %p34_p4 = por %p33_p2, %p32_p1  ;;  %p39_p5 = scmp.eq.s32.totalorder %s1390_s22, 0 }
   0x9   : > { %p1458_p6 = scmp.lt.s32.totalorder %s1639_s21, 6  ;;  %s184_s28 = sand.u32 1, %s1635_s20  }
   0xa   : > { %p1711_p7 = por %p39_p5, %p38_p3  ;;  %s1450_s29 = smul.u32 88, %s184_s28 }
   0xb   : > { %s1421_s30 = smul.u32 88, %s1639_s21  ;;  %p1717_p8 = pnand %p1458_p6, %p34_p4 }
   0xc   : > { %s188_s10 = scalar_lea.vmem [#allocation2], %s1450_s29  ;;  %p1395_p9 = scmp.ge.s32.totalorder %s1639_s21, 1 }
   0xd   : > { %s193_s9 = scalar_lea.hbm %s2410_s0, %s1421_s30  ;;  %s196_s11 = sshll.u32 %s188_s10, 4  ;;  %s197_s11 = int_to_ptr.vmem [resolvable:$true] %s196_s11 }
   0xe   : > { %s194_s12 = sshll.u32 %s193_s9, 4  ;;  %s185_s13 = scalar_lea.sflag [#allocation3], %s184_s28  ;;  %s195_s12 = int_to_ptr.hbm [resolvable:$true] %s194_s12 }
   0xf   : > { %s1575_s14 = sshra.s32 %s195_s12, 4  ;;  %p1579_p11 = pneg %p1717_p8  ;;  %s1576_s14 = int_to_ptr.hbm [resolvable:$true] %s1575_s14 }
  0x10   : > { %s1577_s15 = scalar_lea.hbm %s1576_s14, 88  ;;  %s1582_s18 = scalar_lea.hbm %s2410_s0, 528 }
  0x11   : > { %p1578_p10 = scmp.ne.s32.totalorder %s1576_s14, %s1577_s15  ;;  %p1583_p0 = scmp.lt.s32.totalorder %s1576_s14, %s2410_s0 }
  0x12   : > { %p1584_p1 = scmp.lt.s32.totalorder %s1582_s18, %s1577_s15 }
  0x13   : > { %p1580_p12 = pnand %p1579_p11, %p1578_p10 }
  0x14   : > { %p1585_p2 = por %p1584_p1, %p1583_p0 }
  0x15   : > { %p1581_p13 = pneg %p1580_p12 }
  0x17   : > { %p1586_p3 = pnand %p1585_p2, %p1581_p13 }
  0x19   : > { %1589 = shalt.err (!%p1586_p3)
}
  0x1a   : > { %s1641_s28 = smov 128   ;;  %s1642_s29 = smov 8  }
  0x1b   : > { %1457 = dma.hbm_to_vmem [thread:$0]  (!%p1717_p8), %s195_s12, 1408, %s197_s11, %s185_s13, %s1641_s28, %s1641_s28, %s1642_s29  }
  0x1c   : > { %p204_p4 = scmp.lt.s32.totalorder %s1639_s21, 7 }
  0x1e   : > { %p205_p5 = pnand %p1395_p9, %p204_p4 }
  0x1f   : > { %s210_s30 = sand.u32 (!%p205_p5), 1, %s1631_s19  }
  0x20   : > { %208 = sbr.rel (%p205_p5) target bundleno = 1382 (0x566), region = 40  ;;  %s211_s8 = scalar_lea.sflag (!%p205_p5), [#allocation3], %s210_s30 }
  0x21   : > { %s1451_s7 = smul.u32 (!%p205_p5), 88, %s210_s30 }
  0x23   : > { %s214_s9 = scalar_lea.vmem (!%p205_p5), [#allocation2], %s1451_s7 }
  0x25   : > { %1622 = dma.done.wait (%p1711_p7), %s211_s8, 1408  }
  0x26   : > { %1624 = vsyncadd (%p1711_p7), %s211_s8, 4294965888  ;;  %v253_v0 = vld [vmem:[%s214_s9 + $0x20] sm:$0xff]  ;;  %v251_v1 = vld [vmem:[%s214_s9 + $0x10] sm:$0xff]  ;;  %v1643_v11 = vmov 128.0   ;;  %s243_s24 = smul.u32 11, %s1390_s22 }
  0x27   : > { %v249_v2 = vld [vmem:[%s214_s9] sm:$0xff]  ;;  %275 = vadd.xlane.f32.xlu2 %v253_v0  ;;  %271 = vadd.xlane.f32.xlu1 %v251_v1  ;;  %v256_v3 = vld [vmem:[%s214_s9 + $0x38] sm:$0xff]  ;;  %v250_v5 = vld [vmem:[%s214_s9 + $0x8] sm:$0xff]  ;;  %1503 = vrcp.f32 %v1643_v11 }
  0x28   : > { %267 = vadd.xlane.f32.xlu0 %v249_v2  ;;  %v252_v4 = vld [vmem:[%s214_s9 + $0x18] sm:$0xff]  ;;  %v257_v6 = vld [vmem:[%s214_s9 + $0x40] sm:$0xff]  ;;  %v1743_v7 = vld [vmem:[%s214_s9 + $0x28] sm:$0xff]  ;;  %p244_p6 = scmp.lt.s32.totalorder %s243_s24, 65 }
  0x29   : > { %v1746_v8 = vld [vmem:[%s214_s9 + $0x48] sm:$0xff]  ;;  %v1748_v9 = vld [vmem:[%s214_s9 + $0x30] sm:$0xff]  ;;  %v509_v32 = vld [vmem:[%s2411_s1 + $0x78] sm:$0xff] }
  0x2a   : > { %v1752_v10 = vld [vmem:[%s214_s9 + $0x50] sm:$0xff]  ;;  %511 = vmatpush.msra.mxu0 %v509_v32  ;;  %1422 = vmatpush.msra.mxu3 %v509_v32  ;;  %v506_v41 = vld [vmem:[%s2411_s1 + $0x60] sm:$0xff]  ;;  %s2429_s24 = smov (!%p244_p6, %s243_s24), 65 }
  0x2b   : > { %v508_v33 = vld [vmem:[%s2411_s1 + $0x70] sm:$0xff]  ;;  %v507_v37 = vld [vmem:[%s2411_s1 + $0x68] sm:$0xff]  ;;  %s1396_s21 = sshll.u32 %s2429_s24, 3 }
  0x2c   : > { %512 = vmatpush.msra.mxu0 %v508_v33  ;;  %1423 = vmatpush.msra.mxu3 %v508_v33  ;;  %v496_v11 = vld [vmem:[%s2411_s1 + $0x10] sm:$0xff]  ;;  %s2349_s30 = scalar_lea.vmem %s2415_s5, %s1396_s21 }
  0x2d   : > { %v1504_v12 = vpop.eup %1503 }
  0x2e   : > { %v290_v13 = vmul.f32 128.0, %v1504_v12  ;;  %vm294_vm0 = vweird.f32 %v1504_v12  ;;  %513 = vmatpush.msra.mxu0 %v507_v37  ;;  %1424 = vmatpush.msra.mxu3 %v507_v37 }
  0x2f   : > { %281 = vadd.xlane.f32.xlu2 %v256_v3  ;;  %273 = vadd.xlane.f32.xlu1 %v252_v4 }
  0x30   : > { %269 = vadd.xlane.f32.xlu0 %v250_v5  ;;  %v291_v14 = vsub.f32 1.0, %v290_v13  ;;  %514 = vmatpush.msra.mxu0 %v506_v41  ;;  %v494_v13 = vld [vmem:[%s2411_s1] sm:$0xff] }
  0x31   : > { %1425 = vmatpush.msra.mxu3 %v506_v41 }
  0x32   : > { %v292_v15 = vmul.f32 %v1504_v12, %v291_v14 }
  0x34   : > { %v293_v16 = vadd.f32 %v1504_v12, %v292_v15 }
  0x36   : > { %v1755_v17 = vsel %vm294_vm0, %v1504_v12, %v293_v16  ;;  %v495_v12 = vld [vmem:[%s2411_s1 + $0x8] sm:$0xff] }
  0x37   : > { %283 = vadd.xlane.f32.xlu1 %v257_v6 }
  0x38   : > { %277 = vadd.xlane.f32.xlu0 %v1743_v7 }
  0x3f   : > { %285 = vadd.xlane.f32.xlu1 %v1746_v8 }
  0x40   : > { %279 = vadd.xlane.f32.xlu0 %v1748_v9 }
  0x48   : > { %287 = vadd.xlane.f32.xlu0 %v1752_v10 }
  0x9a   : > { %v276_v18 = vpop.xlane.xlu2 %275  ;;  %v272_v19 = vpop.xlane.xlu1 %271 }
  0x9b   : > { %v300_v20 = vmul.f32 %v1755_v17, %v276_v18  ;;  %v298_v21 = vmul.f32 %v1755_v17, %v272_v19  ;;  %v268_v22 = vpop.xlane.xlu0 %267 }
  0x9c   : > { %v296_v23 = vmul.f32 %v1755_v17, %v268_v22 }
  0x9d   : > { %v1760_v24 = vsub.f32 %v253_v0, %v300_v20  ;;  %v1762_v25 = vsub.f32 %v251_v1, %v298_v21 }
  0x9e   : > { %v1764_v26 = vsub.f32 %v249_v2, %v296_v23  ;;  %v505_v2 = vld [vmem:[%s2411_s1 + $0x58] sm:$0xff] }
  0x9f   : > { %v320_v27 = vmul.f32 %v1762_v25, %v1762_v25  ;;  %v322_v28 = vmul.f32 %v1760_v24, %v1760_v24  ;;  %515 = vmatpush.msra.mxu0 %v505_v2  ;;  %1426 = vmatpush.msra.mxu3 %v505_v2 }
  0xa0   : > { %v318_v29 = vmul.f32 %v1764_v26, %v1764_v26 }
  0xa1   : > { %333 = vadd.xlane.f32.xlu1 %v320_v27  ;;  %337 = vadd.xlane.f32.xlu0 %v322_v28 }
  0xa2   : > { %329 = vadd.xlane.f32.xlu2 %v318_v29  ;;  %v282_v30 = vpop.xlane.xlu2 %281  ;;  %v274_v31 = vpop.xlane.xlu1 %273 }
  0xa3   : > { %v303_v34 = vmul.f32 %v1755_v17, %v282_v30  ;;  %v270_v35 = vpop.xlane.xlu0 %269  ;;  %v299_v39 = vmul.f32 %v1755_v17, %v274_v31 }
  0xa4   : > { %v297_v36 = vmul.f32 %v1755_v17, %v270_v35 }
  0xa5   : > { %v1783_v38 = vsub.f32 %v256_v3, %v303_v34  ;;  %v1795_v44 = vsub.f32 %v252_v4, %v299_v39  ;;  %v504_v3 = vld [vmem:[%s2411_s1 + $0x50] sm:$0xff]  ;;  %v503_v4 = vld [vmem:[%s2411_s1 + $0x48] sm:$0xff] }
  0xa6   : > { %v1786_v40 = vsub.f32 %v250_v5, %v297_v36  ;;  %516 = vmatpush.msra.mxu0 %v504_v3  ;;  %1427 = vmatpush.msra.mxu3 %v504_v3  ;;  %v502_v5 = vld [vmem:[%s2411_s1 + $0x40] sm:$0xff] }
  0xa7   : > { %v325_v42 = vmul.f32 %v1783_v38, %v1783_v38  ;;  %v321_v50 = vmul.f32 %v1795_v44, %v1795_v44 }
  0xa8   : > { %v319_v43 = vmul.f32 %v1786_v40, %v1786_v40  ;;  %517 = vmatpush.msra.mxu0 %v503_v4  ;;  %1428 = vmatpush.msra.mxu3 %v503_v4 }
  0xa9   : > { %343 = vadd.xlane.f32.xlu1 %v325_v42 }
  0xaa   : > { %331 = vadd.xlane.f32.xlu2 %v319_v43  ;;  %v284_v45 = vpop.xlane.xlu1 %283  ;;  %518 = vmatpush.msra.mxu0 %v502_v5 }
  0xab   : > { %v304_v46 = vmul.f32 %v1755_v17, %v284_v45  ;;  %v278_v47 = vpop.xlane.xlu0 %277  ;;  %1429 = vmatpush.msra.mxu3 %v502_v5 }
  0xac   : > { %v301_v49 = vmul.f32 %v1755_v17, %v278_v47 }
  0xad   : > { %v1798_v48 = vsub.f32 %v257_v6, %v304_v46  ;;  %v501_v6 = vld [vmem:[%s2411_s1 + $0x38] sm:$0xff] }
  0xae   : > { %v1806_v52 = vsub.f32 %v1743_v7, %v301_v49  ;;  %519 = vmatpush.msra.mxu0 %v501_v6  ;;  %1430 = vmatpush.msra.mxu3 %v501_v6  ;;  %v500_v7 = vld [vmem:[%s2411_s1 + $0x30] sm:$0xff] }
  0xaf   : > { %v326_v51 = vmul.f32 %v1798_v48, %v1798_v48 }
  0xb0   : > { %v323_v57 = vmul.f32 %v1806_v52, %v1806_v52  ;;  %520 = vmatpush.msra.mxu0 %v500_v7  ;;  %1431 = vmatpush.msra.mxu3 %v500_v7 }
  0xb1   : > { %345 = vadd.xlane.f32.xlu0 %v326_v51 }
  0xb2   : > { %335 = vadd.xlane.f32.xlu2 %v321_v50  ;;  %v286_v54 = vpop.xlane.xlu1 %285 }
  0xb3   : > { %v280_v53 = vpop.xlane.xlu0 %279  ;;  %v305_v58 = vmul.f32 %v1755_v17, %v286_v54 }
  0xb4   : > { %v302_v55 = vmul.f32 %v1755_v17, %v280_v53 }
  0xb5   : > { %v1818_v60 = vsub.f32 %v1746_v8, %v305_v58  ;;  %v499_v8 = vld [vmem:[%s2411_s1 + $0x28] sm:$0xff] }
  0xb6   : > { %v1810_v56 = vsub.f32 %v1748_v9, %v302_v55  ;;  %521 = vmatpush.msra.mxu0 %v499_v8  ;;  %1432 = vmatpush.msra.mxu3 %v499_v8  ;;  %v498_v9 = vld [vmem:[%s2411_s1 + $0x20] sm:$0xff] }
  0xb7   : > { %v327_v0 = vmul.f32 %v1818_v60, %v1818_v60 }
  0xb8   : > { %v324_v59 = vmul.f32 %v1810_v56, %v1810_v56  ;;  %522 = vmatpush.msra.mxu0 %v498_v9  ;;  %1433 = vmatpush.msra.mxu3 %v498_v9 }
  0xba   : > { %339 = vadd.xlane.f32.xlu2 %v323_v57  ;;  %341 = vadd.xlane.f32.xlu1 %v324_v59 }
  0xbb   : > { %v288_v61 = vpop.xlane.xlu0 %287 }
  0xbc   : > { %v306_v62 = vmul.f32 %v1755_v17, %v288_v61 }
  0xbe   : > { %v1822_v63 = vsub.f32 %v1752_v10, %v306_v62  ;;  %v497_v10 = vld [vmem:[%s2411_s1 + $0x18] sm:$0xff] }
  0xbf   : > { %523 = vmatpush.msra.mxu0 %v497_v10  ;;  %1434 = vmatpush.msra.mxu3 %v497_v10 }
  0xc0   : > { %v328_v1 = vmul.f32 %v1822_v63, %v1822_v63 }
  0xc1   : > { %524 = vmatpush.msra.mxu0 %v496_v11  ;;  %1435 = vmatpush.msra.mxu3 %v496_v11 }
  0xc2   : > { %347 = vadd.xlane.f32.xlu2 %v327_v0  ;;  %349 = vadd.xlane.f32.xlu0 %v328_v1 }
  0xc3   : > { %525 = vmatpush.msra.mxu0 %v495_v12  ;;  %1436 = vmatpush.msra.mxu3 %v495_v12 }
  0xc5   : > { %526 = vmatpush.msra.mxu0 %v494_v13  ;;  %1437 = vmatpush.msra.mxu3 %v494_v13 }
 0x114   : > { %v334_v14 = vpop.xlane.xlu1 %333  ;;  %v338_v21 = vpop.xlane.xlu0 %337 }
 0x115   : > { %v353_v15 = vmul.f32 %v334_v14, %v1755_v17  ;;  %v330_v16 = vpop.xlane.xlu2 %329  ;;  %v355_v31 = vmul.f32 %v338_v21, %v1755_v17 }
 0x116   : > { %v351_v18 = vmul.f32 %v330_v16, %v1755_v17 }
 0x117   : > { %v1866_v19 = vadd.f32 1e-05, %v353_v15  ;;  %v1874_v36 = vadd.f32 1e-05, %v355_v31 }
 0x118   : > { %v362_v20 = vadd.f32 1e-05, %v351_v18 }
 0x119   : > { %vm399_vm9 = vweird.f32 %v1866_v19 }
 0x11a   : > { %1505 = vrsqrt.f32 %v362_v20  ;;  %vm379_vm2 = vweird.f32 %v362_v20 }
 0x11b   : > { %1507 = vrsqrt.f32 %v1866_v19 }
 0x11c   : > { %v344_v22 = vpop.xlane.xlu1 %343 }
 0x11d   : > { %v358_v23 = vmul.f32 %v344_v22, %v1755_v17  ;;  %v332_v27 = vpop.xlane.xlu2 %331 }
 0x11e   : > { %v352_v28 = vmul.f32 %v332_v27, %v1755_v17 }
 0x11f   : > { %v369_v29 = vadd.f32 1e-05, %v358_v23 }
 0x120   : > { %v1506_v30 = vpop.eup %1505  ;;  %v363_v32 = vadd.f32 1e-05, %v352_v28 }
 0x121   : > { %v374_v33 = vmul.f32 %v1506_v30, %v362_v20  ;;  %1509 = vrsqrt.f32 %v369_v29  ;;  %v1872_v34 = vpop.eup %1507  ;;  %vm380_vm1 = vweird.f32 %v1506_v30  ;;  %vm449_vm4 = vweird.f32 %v369_v29 }
 0x122   : > { %1511 = vrsqrt.f32 %v363_v32  ;;  %v394_v39 = vmul.f32 %v1872_v34, %v1866_v19  ;;  %vm381_vm3 = vmor %vm379_vm2, %vm380_vm1  ;;  %vm389_vm7 = vweird.f32 %v363_v32  ;;  %vm400_vm11 = vweird.f32 %v1872_v34 }
 0x123   : > { %v375_v35 = vmul.f32 %v1506_v30, %v374_v33  ;;  %1513 = vrsqrt.f32 %v1874_v36  ;;  %vm1925_vm14 = vmor %vm399_vm9, %vm400_vm11 }
 0x124   : > { %v346_v37 = vpop.xlane.xlu0 %345  ;;  %v395_v54 = vmul.f32 %v1872_v34, %v394_v39 }
 0x125   : > { %v376_v41 = vmul.f32 0.5, %v375_v35  ;;  %v336_v42 = vpop.xlane.xlu2 %335  ;;  %v359_v43 = vmul.f32 %v346_v37, %v1755_v17 }
 0x126   : > { %v354_v45 = vmul.f32 %v336_v42, %v1755_v17  ;;  %v396_v1 = vmul.f32 0.5, %v395_v54 }
 0x127   : > { %v1510_v46 = vpop.eup %1509  ;;  %v377_v47 = vsub.f32 1.5, %v376_v41  ;;  %v1880_v49 = vadd.f32 1e-05, %v359_v43 }
 0x128   : > { %v1512_v50 = vpop.eup %1511  ;;  %v444_v51 = vmul.f32 %v1510_v46, %v369_v29  ;;  %v1883_v53 = vadd.f32 1e-05, %v354_v45  ;;  %vm450_vm5 = vweird.f32 %v1510_v46  ;;  %v397_v14 = vsub.f32 1.5, %v396_v1 }
 0x129   : > { %v384_v55 = vmul.f32 %v1512_v50, %v363_v32  ;;  %1515 = vrsqrt.f32 %v1880_v49  ;;  %v378_v57 = vmul.f32 %v1506_v30, %v377_v47  ;;  %v1889_v4 = vpop.eup %1513  ;;  %vm390_vm6 = vweird.f32 %v1512_v50  ;;  %vm1898_vm8 = vmor %vm449_vm4, %vm450_vm5 }
 0x12a   : > { %v445_v58 = vmul.f32 %v1510_v46, %v444_v51  ;;  %1517 = vrsqrt.f32 %v1883_v53  ;;  %v414_v20 = vmul.f32 %v1889_v4, %v1874_v36  ;;  %vm391_vm10 = vmor %vm389_vm7, %vm390_vm6  ;;  %vm459_vm12 = vweird.f32 %v1880_v49 }
 0x12b   : > { %v385_v59 = vmul.f32 %v1512_v50, %v384_v55  ;;  %v382_v61 = vsel %vm381_vm3, %v1506_v30, %v378_v57  ;;  %v398_v37 = vmul.f32 %v1872_v34, %v397_v14  ;;  %vm409_vm0 = vweird.f32 %v1883_v53 }
 0x12c   : > { %v446_v62 = vmul.f32 0.5, %v445_v58  ;;  %v483_v0 = vmul.f32 %v382_v61, %v1764_v26  ;;  %vm419_vm3 = vweird.f32 %v1874_v36  ;;  %vm420_vm4 = vweird.f32 %v1889_v4 }
 0x12d   : > { %v386_v2 = vmul.f32 0.5, %v385_v59  ;;  %v340_v3 = vpop.xlane.xlu2 %339  ;;  %v342_v7 = vpop.xlane.xlu1 %341  ;;  %vm1952_vm6 = vmor %vm419_vm3, %vm420_vm4 }
 0x12e   : > { %v447_v5 = vsub.f32 1.5, %v446_v62  ;;  %v356_v6 = vmul.f32 %v340_v3, %v1755_v17  ;;  %527 = vmatmul.f32.vlgmr.msra.gmra.mxu0 %v483_v0  ;;  %v357_v16 = vmul.f32 %v342_v7, %v1755_v17 }
 0x12f   : > { %v1516_v8 = vpop.eup %1515  ;;  %v387_v9 = vsub.f32 1.5, %v386_v2 }
 0x130   : > { %v1892_v10 = vpop.eup %1517  ;;  %v454_v26 = vmul.f32 %v1516_v8, %v1880_v49  ;;  %v1895_v11 = vadd.f32 1e-05, %v356_v6  ;;  %v448_v12 = vmul.f32 %v1510_v46, %v447_v5  ;;  %v1916_v32 = vadd.f32 1e-05, %v357_v16 }
 0x131   : > { %v404_v15 = vmul.f32 %v1892_v10, %v1883_v53  ;;  %v388_v18 = vmul.f32 %v1512_v50, %v387_v9  ;;  %vm460_vm13 = vweird.f32 %v1516_v8  ;;  %vm410_vm1 = vweird.f32 %v1892_v10 }
 0x132   : > { %v455_v21 = vmul.f32 %v1516_v8, %v454_v26  ;;  %v452_v27 = vsel %vm1898_vm8, %v1510_v46, %v448_v12  ;;  %1519 = vrsqrt.f32 %v1895_v11  ;;  %vm461_vm15 = vmor %vm459_vm12, %vm460_vm13  ;;  %vm429_vm9 = vweird.f32 %v1895_v11 }
 0x133   : > { %v405_v22 = vmul.f32 %v1892_v10, %v404_v15  ;;  %v392_v23 = vsel %vm391_vm10, %v1512_v50, %v388_v18  ;;  %v490_v30 = vmul.f32 %v452_v27, %v1783_v38  ;;  %1521 = vrsqrt.f32 %v1916_v32  ;;  %vm411_vm2 = vmor %vm409_vm0, %vm410_vm1 }
 0x134   : > { %v456_v28 = vmul.f32 0.5, %v455_v21  ;;  %v484_v29 = vmul.f32 %v392_v23, %v1786_v40  ;;  %v415_v40 = vmul.f32 %v1889_v4, %v414_v20 }
 0x135   : > { %v406_v31 = vmul.f32 0.5, %v405_v22  ;;  %v348_v33 = vpop.xlane.xlu2 %347  ;;  %v350_v35 = vpop.xlane.xlu0 %349  ;;  %548 = vmatmul.f32.vlgmr.msra.gmra.mxu3 %v490_v30 }
 0x136   : > { %v457_v39 = vsub.f32 1.5, %v456_v28  ;;  %v360_v41 = vmul.f32 %v348_v33, %v1755_v17  ;;  %v361_v42 = vmul.f32 %v350_v35, %v1755_v17  ;;  %530 = vmatmul.f32.gmra.mxu0 %v484_v29  ;;  %v402_v17 = vsel %vm1925_vm14, %v1872_v34, %v398_v37  ;;  %v1496_v29 = vld [vmem:[%s2414_s4] ss:$0 sm:$0xff] }
 0x137   : > { %v407_v47 = vsub.f32 1.5, %v406_v31  ;;  %v416_v51 = vmul.f32 0.5, %v415_v40  ;;  %v485_v49 = vmul.f32 %v402_v17, %v1762_v25 }
 0x138   : > { %v371_v43 = vadd.f32 1e-05, %v360_v41  ;;  %v372_v45 = vadd.f32 1e-05, %v361_v42  ;;  %v458_v46 = vmul.f32 %v1516_v8, %v457_v39  ;;  %v1936_v19 = vpop.eup %1519 }
 0x139   : > { %v424_v55 = vmul.f32 %v1936_v19, %v1895_v11  ;;  %v408_v57 = vmul.f32 %v1892_v10, %v407_v47  ;;  %v1522_v34 = vpop.eup %1521  ;;  %v417_v53 = vsub.f32 1.5, %v416_v51  ;;  %vm430_vm10 = vweird.f32 %v1936_v19 }
 0x13a   : > { %1523 = vrsqrt.f32 %v371_v43  ;;  %v462_v50 = vsel %vm461_vm15, %v1516_v8, %v458_v46  ;;  %v434_v1 = vmul.f32 %v1522_v34, %v1916_v32  ;;  %vm469_vm5 = vweird.f32 %v371_v43  ;;  %vm431_vm13 = vmor %vm429_vm9, %vm430_vm10 }
 0x13b   : > { %1525 = vrsqrt.f32 %v372_v45  ;;  %v491_v54 = vmul.f32 %v462_v50, %v1798_v48  ;;  %v425_v61 = vmul.f32 %v1936_v19, %v424_v55  ;;  %v412_v0 = vsel %vm411_vm2, %v1892_v10, %v408_v57 }
 0x13c   : > { %v486_v3 = vmul.f32 %v412_v0, %v1795_v44  ;;  %v418_v5 = vmul.f32 %v1889_v4, %v417_v53  ;;  %v435_v44 = vmul.f32 %v1522_v34, %v434_v1  ;;  %vm479_vm11 = vweird.f32 %v372_v45 }
 0x13d   : > { %551 = vmatmul.f32.gmra.mxu3 %v491_v54  ;;  %v426_v6 = vmul.f32 0.5, %v425_v61  ;;  %vm439_vm15 = vweird.f32 %v1916_v32  ;;  %vm440_vm0 = vweird.f32 %v1522_v34  ;;  %vm561_vm2 = vcmask 523264  }
 0x13e   : > { %533 = vmatmul.f32.gmra.mxu0 %v485_v49  ;;  %v422_v10 = vsel %vm1952_vm6, %v1889_v4, %v418_v5  ;;  %v436_v18 = vmul.f32 0.5, %v435_v44  ;;  %vm441_vm1 = vmor %vm439_vm15, %vm440_vm0 }
 0x13f   : > { %v427_v26 = vsub.f32 1.5, %v426_v6  ;;  %v487_v15 = vmul.f32 %v422_v10, %v1760_v24 }
 0x140   : > { %v1524_v58 = vpop.eup %1523  ;;  %v437_v21 = vsub.f32 1.5, %v436_v18 }
 0x141   : > { %v1526_v59 = vpop.eup %1525  ;;  %v464_v62 = vmul.f32 %v1524_v58, %v371_v43  ;;  %vm470_vm7 = vweird.f32 %v1524_v58  ;;  %v428_v20 = vmul.f32 %v1936_v19, %v427_v26 }
 0x142   : > { %v474_v25 = vmul.f32 %v1526_v59, %v372_v45  ;;  %vm471_vm8 = vmor %vm469_vm5, %vm470_vm7  ;;  %vm480_vm12 = vweird.f32 %v1526_v59 }
 0x143   : > { %v465_v48 = vmul.f32 %v1524_v58, %v464_v62  ;;  %vm481_vm14 = vmor %vm479_vm11, %vm480_vm12  ;;  %v432_v11 = vsel %vm431_vm13, %v1936_v19, %v428_v20  ;;  %v1644_v62 = vmov 64.0  }
 0x144   : > { %v475_v2 = vmul.f32 %v1526_v59, %v474_v25  ;;  %v488_v23 = vmul.f32 %v432_v11, %v1806_v52  ;;  %1527 = vrcp.f32 %v1644_v62 }
 0x145   : > { %v466_v7 = vmul.f32 0.5, %v465_v48 }
 0x146   : > { %v476_v36 = vmul.f32 0.5, %v475_v2  ;;  %536 = vmatmul.f32.gmra.mxu0 %v486_v3 }
 0x147   : > { %v467_v9 = vsub.f32 1.5, %v466_v7 }
 0x148   : > { %v477_v12 = vsub.f32 1.5, %v476_v36 }
 0x149   : > { %v468_v13 = vmul.f32 %v1524_v58, %v467_v9 }
 0x14a   : > { %v478_v4 = vmul.f32 %v1526_v59, %v477_v12  ;;  %v1528_v0 = vpop.eup %1527 }
 0x14b   : > { %v472_v14 = vsel %vm471_vm8, %v1524_v58, %v468_v13  ;;  %v596_v25 = vmul.f32 64.0, %v1528_v0  ;;  %vm600_vm3 = vweird.f32 %v1528_v0 }
 0x14c   : > { %v492_v16 = vmul.f32 %v472_v14, %v1818_v60  ;;  %v482_v22 = vsel %vm481_vm14, %v1526_v59, %v478_v4  ;;  %v438_v60 = vmul.f32 %v1522_v34, %v437_v21 }
 0x14d   : > { %v493_v24 = vmul.f32 %v482_v22, %v1822_v63  ;;  %v597_v48 = vsub.f32 1.0, %v596_v25 }
 0x14e   : > { %539 = vmatmul.f32.gmra.mxu0 %v487_v15  ;;  %554 = vmatmul.f32.gmra.mxu3 %v492_v16  ;;  %v442_v27 = vsel %vm441_vm1, %v1522_v34, %v438_v60 }
 0x14f   : > { %v489_v28 = vmul.f32 %v442_v27, %v1810_v56  ;;  %v598_v1 = vmul.f32 %v1528_v0, %v597_v48 }
 0x151   : > { %v599_v2 = vadd.f32 %v1528_v0, %v598_v1 }
 0x153   : > { %v1991_v3 = vsel %vm600_vm3, %v1528_v0, %v599_v2 }
 0x156   : > { %542 = vmatmul.f32.gmra.mxu0 %v488_v23  ;;  %557 = vmatmul.f32.gmra.mxu3 %v493_v24 }
 0x15e   : > { %545 = vmatmul.f32.gmra.mxu0 %v489_v28 }
 0x1ab   : > { %v528_v30 = vpop.f32.mrf.mxu0 }
 0x1ac   : > { %v529_v31 = vadd.f32 %v1496_v29, %v528_v30 }
 0x1ae   : > { %v562_v32 = vsel %vm561_vm2, %v529_v31, 0.0 }
 0x1af   : > { %563 = vadd.xlane.f32.xlu1 %v562_v32 }
 0x1b3   : > { %v531_v52 = vpop.f32.mrf.mxu0 }
 0x1b4   : > { %v532_v63 = vadd.f32 %v1496_v29, %v531_v52 }
 0x1b6   : > { %v565_v33 = vsel %vm561_vm2, %v532_v63, 0.0 }
 0x1b7   : > { %566 = vadd.xlane.f32.xlu2 %v565_v33 }
 0x1b8   : > { %v549_v35 = vpop.f32.mrf.mxu3 }
 0x1b9   : > { %v1974_v37 = vadd.f32 %v1496_v29, %v549_v35 }
 0x1bb   : > { %v534_v56 = vpop.f32.mrf.mxu0  ;;  %v583_v12 = vsel %vm561_vm2, %v1974_v37, 0.0 }
 0x1bc   : > { %v535_v39 = vadd.f32 %v1496_v29, %v534_v56 }
 0x1be   : > { %v568_v41 = vsel %vm561_vm2, %v535_v39, 0.0 }
 0x1bf   : > { %569 = vadd.xlane.f32.xlu0 %v568_v41 }
 0x1c0   : > { %v552_v42 = vpop.f32.mrf.mxu3 }
 0x1c1   : > { %v1977_v38 = vadd.f32 %v1496_v29, %v552_v42 }
 0x1c3   : > { %v537_v40 = vpop.f32.mrf.mxu0  ;;  %v586_v20 = vsel %vm561_vm2, %v1977_v38, 0.0 }
 0x1c4   : > { %v538_v43 = vadd.f32 %v1496_v29, %v537_v40 }
 0x1c6   : > { %v571_v45 = vsel %vm561_vm2, %v538_v43, 0.0 }
 0x1c7   : > { %572 = vadd.xlane.f32.xlu1 %v571_v45 }
 0x1cb   : > { %v540_v46 = vpop.f32.mrf.mxu0 }
 0x1cc   : > { %v541_v47 = vadd.f32 %v1496_v29, %v540_v46 }
 0x1ce   : > { %v574_v17 = vsel %vm561_vm2, %v541_v47, 0.0 }
 0x1cf   : > { %575 = vadd.xlane.f32.xlu2 %v574_v17  ;;  %v853_v17 = vld [vmem:[%s2412_s2 + $0x38] sm:$0xff] }
 0x1d0   : > { %896 = vmatpush.msra.mxu1 %v853_v17  ;;  %1438 = vmatpush.msrb.mxu3 %v853_v17 }
 0x1d1   : > { %v555_v55 = vpop.f32.mrf.mxu3 }
 0x1d2   : > { %v1983_v34 = vadd.f32 %v1496_v29, %v555_v55  ;;  %v847_v55 = vld [vmem:[%s2412_s2 + $0x8] sm:$0xff] }
 0x1d3   : > { %v543_v19 = vpop.f32.mrf.mxu0 }
 0x1d4   : > { %v544_v50 = vadd.f32 %v1496_v29, %v543_v19  ;;  %v589_v58 = vsel %vm561_vm2, %v1983_v34, 0.0  ;;  %v852_v19 = vld [vmem:[%s2412_s2 + $0x30] sm:$0xff] }
 0x1d5   : > { %897 = vmatpush.msra.mxu1 %v852_v19  ;;  %1439 = vmatpush.msrb.mxu3 %v852_v19 }
 0x1d6   : > { %v577_v51 = vsel %vm561_vm2, %v544_v50, 0.0 }
 0x1d7   : > { %578 = vadd.xlane.f32.xlu0 %v577_v51  ;;  %v850_v51 = vld [vmem:[%s2412_s2 + $0x20] sm:$0xff] }
 0x1d9   : > { %v558_v53 = vpop.f32.mrf.mxu3 }
 0x1da   : > { %v1987_v59 = vadd.f32 %v1496_v29, %v558_v53 }
 0x1db   : > { %v546_v49 = vpop.f32.mrf.mxu0 }
 0x1dc   : > { %v547_v54 = vadd.f32 %v1496_v29, %v546_v49  ;;  %v592_v61 = vsel %vm561_vm2, %v1987_v59, 0.0  ;;  %v849_v49 = vld [vmem:[%s2412_s2 + $0x18] sm:$0xff] }
 0x1de   : > { %v580_v57 = vsel %vm561_vm2, %v547_v54, 0.0 }
 0x1df   : > { %581 = vadd.xlane.f32.xlu2 %v580_v57 }
 0x1e7   : > { %590 = vadd.xlane.f32.xlu2 %v589_v58 }
 0x1ef   : > { %593 = vadd.xlane.f32.xlu2 %v592_v61 }
 0x222   : > { %v564_v5 = vpop.xlane.xlu1 %563 }
 0x223   : > { %v602_v6 = vmul.f32 %v1991_v3, %v564_v5 }
 0x225   : > { %v1994_v7 = vsub.f32 %v529_v31, %v602_v6 }
 0x227   : > { %v624_v8 = vmul.f32 %v1994_v7, %v1994_v7 }
 0x229   : > { %v635_v36 = vsel %vm561_vm2, %v624_v8, 0.0 }
 0x22a   : > { %v567_v9 = vpop.xlane.xlu2 %566  ;;  %636 = vadd.xlane.f32.xlu1 %v635_v36 }
 0x22b   : > { %v603_v10 = vmul.f32 %v1991_v3, %v567_v9 }
 0x22d   : > { %v2000_v26 = vsub.f32 %v532_v63, %v603_v10 }
 0x22f   : > { %v625_v44 = vmul.f32 %v2000_v26, %v2000_v26 }
 0x231   : > { %v638_v13 = vsel %vm561_vm2, %v625_v44, 0.0 }
 0x232   : > { %584 = vadd.xlane.f32.xlu1 %v583_v12  ;;  %639 = vadd.xlane.f32.xlu0 %v638_v13  ;;  %v570_v14 = vpop.xlane.xlu0 %569 }
 0x233   : > { %v604_v15 = vmul.f32 %v1991_v3, %v570_v14 }
 0x235   : > { %v2008_v16 = vsub.f32 %v535_v39, %v604_v15 }
 0x237   : > { %v626_v18 = vmul.f32 %v2008_v16, %v2008_v16 }
 0x239   : > { %v641_v4 = vsel %vm561_vm2, %v626_v18, 0.0 }
 0x23a   : > { %v573_v21 = vpop.xlane.xlu1 %572  ;;  %587 = vadd.xlane.f32.xlu1 %v586_v20  ;;  %642 = vadd.xlane.f32.xlu0 %v641_v4 }
 0x23b   : > { %v605_v11 = vmul.f32 %v1991_v3, %v573_v21 }
 0x23d   : > { %v2016_v22 = vsub.f32 %v538_v43, %v605_v11 }
 0x23f   : > { %v627_v23 = vmul.f32 %v2016_v22, %v2016_v22 }
 0x241   : > { %v644_v24 = vsel %vm561_vm2, %v627_v23, 0.0 }
 0x242   : > { %v576_v60 = vpop.xlane.xlu2 %575  ;;  %645 = vadd.xlane.f32.xlu0 %v644_v24 }
 0x243   : > { %v606_v27 = vmul.f32 %v1991_v3, %v576_v60  ;;  %v2095_v60 = vld [vmem:[%s2414_s4 + $0x1] ss:$0 sm:$0xff] }
 0x245   : > { %v2022_v28 = vsub.f32 %v541_v47, %v606_v27 }
 0x247   : > { %v628_v29 = vmul.f32 %v2022_v28, %v2022_v28 }
 0x249   : > { %v647_v30 = vsel %vm561_vm2, %v628_v29, 0.0 }
 0x24a   : > { %648 = vadd.xlane.f32.xlu1 %v647_v30  ;;  %v579_v31 = vpop.xlane.xlu0 %578 }
 0x24b   : > { %v607_v32 = vmul.f32 %v1991_v3, %v579_v31 }
 0x24d   : > { %v2028_v52 = vsub.f32 %v544_v50, %v607_v32  ;;  %v851_v50 = vld [vmem:[%s2412_s2 + $0x28] sm:$0xff]  ;;  %v2103_v32 = vld [vmem:[%s2414_s4 + $0x2] ss:$0 sm:$0xff] }
 0x24e   : > { %898 = vmatpush.msra.mxu1 %v851_v50  ;;  %1440 = vmatpush.msrb.mxu3 %v851_v50 }
 0x24f   : > { %v629_v63 = vmul.f32 %v2028_v52, %v2028_v52 }
 0x250   : > { %899 = vmatpush.msra.mxu1 %v850_v51  ;;  %1441 = vmatpush.msrb.mxu3 %v850_v51 }
 0x251   : > { %v650_v33 = vsel %vm561_vm2, %v629_v63, 0.0 }
 0x252   : > { %v582_v35 = vpop.xlane.xlu2 %581  ;;  %651 = vadd.xlane.f32.xlu2 %v650_v33  ;;  %900 = vmatpush.msra.mxu1 %v849_v49 }
 0x253   : > { %v608_v56 = vmul.f32 %v1991_v3, %v582_v35  ;;  %1442 = vmatpush.msrb.mxu3 %v849_v49 }
 0x255   : > { %v2034_v39 = vsub.f32 %v547_v54, %v608_v56  ;;  %v848_v54 = vld [vmem:[%s2412_s2 + $0x10] sm:$0xff] }
 0x256   : > { %901 = vmatpush.msra.mxu1 %v848_v54  ;;  %1443 = vmatpush.msrb.mxu3 %v848_v54 }
 0x257   : > { %v630_v41 = vmul.f32 %v2034_v39, %v2034_v39 }
 0x258   : > { %902 = vmatpush.msra.mxu1 %v847_v55  ;;  %1444 = vmatpush.msrb.mxu3 %v847_v55 }
 0x259   : > { %v653_v42 = vsel %vm561_vm2, %v630_v41, 0.0 }
 0x25a   : > { %v591_v40 = vpop.xlane.xlu2 %590  ;;  %654 = vadd.xlane.f32.xlu0 %v653_v42 }
 0x25b   : > { %v611_v43 = vmul.f32 %v1991_v3, %v591_v40 }
 0x25d   : > { %v2041_v45 = vsub.f32 %v1983_v34, %v611_v43  ;;  %v846_v34 = vld [vmem:[%s2412_s2] sm:$0xff] }
 0x25e   : > { %903 = vmatpush.msra.mxu1 %v846_v34  ;;  %1445 = vmatpush.msrb.mxu3 %v846_v34 }
 0x25f   : > { %v633_v46 = vmul.f32 %v2041_v45, %v2041_v45 }
 0x261   : > { %v662_v47 = vsel %vm561_vm2, %v633_v46, 0.0 }
 0x262   : > { %663 = vadd.xlane.f32.xlu2 %v662_v47  ;;  %v594_v61 = vpop.xlane.xlu2 %593 }
 0x263   : > { %v612_v2 = vmul.f32 %v1991_v3, %v594_v61 }
 0x265   : > { %v2080_v10 = vsub.f32 %v1987_v59, %v612_v2 }
 0x267   : > { %v634_v59 = vmul.f32 %v2080_v10, %v2080_v10 }
 0x269   : > { %v665_v29 = vsel %vm561_vm2, %v634_v59, 0.0 }
 0x29d   : > { %v637_v57 = vpop.xlane.xlu1 %636 }
 0x29e   : > { %v668_v58 = vmul.f32 %v637_v57, %v1991_v3 }
 0x2a0   : > { %v679_v53 = vadd.f32 1e-05, %v668_v58 }
 0x2a2   : > { %1529 = vrsqrt.f32 %v679_v53  ;;  %vm696_vm5 = vweird.f32 %v679_v53 }
 0x2a5   : > { %v585_v62 = vpop.xlane.xlu1 %584  ;;  %v640_v0 = vpop.xlane.xlu0 %639 }
 0x2a6   : > { %v609_v25 = vmul.f32 %v1991_v3, %v585_v62  ;;  %v669_v48 = vmul.f32 %v640_v0, %v1991_v3 }
 0x2a8   : > { %v1530_v1 = vpop.eup %1529  ;;  %v2075_v5 = vsub.f32 %v1974_v37, %v609_v25  ;;  %v680_v6 = vadd.f32 1e-05, %v669_v48 }
 0x2a9   : > { %v691_v8 = vmul.f32 %v1530_v1, %v679_v53  ;;  %vm697_vm4 = vweird.f32 %v1530_v1 }
 0x2aa   : > { %1531 = vrsqrt.f32 %v680_v6  ;;  %v631_v36 = vmul.f32 %v2075_v5, %v2075_v5  ;;  %vm698_vm6 = vmor %vm696_vm5, %vm697_vm4  ;;  %vm706_vm8 = vweird.f32 %v680_v6 }
 0x2ab   : > { %v692_v9 = vmul.f32 %v1530_v1, %v691_v8 }
 0x2ac   : > { %v656_v44 = vsel %vm561_vm2, %v631_v36, 0.0 }
 0x2ad   : > { %v693_v12 = vmul.f32 0.5, %v692_v9  ;;  %657 = vadd.xlane.f32.xlu1 %v656_v44  ;;  %v588_v13 = vpop.xlane.xlu1 %587  ;;  %v643_v14 = vpop.xlane.xlu0 %642 }
 0x2ae   : > { %v610_v15 = vmul.f32 %v1991_v3, %v588_v13  ;;  %v670_v37 = vmul.f32 %v643_v14, %v1991_v3 }
 0x2af   : > { %v694_v18 = vsub.f32 1.5, %v693_v12 }
 0x2b0   : > { %v1532_v20 = vpop.eup %1531  ;;  %v2086_v4 = vsub.f32 %v1977_v38, %v610_v15  ;;  %v681_v21 = vadd.f32 1e-05, %v670_v37 }
 0x2b1   : > { %v695_v11 = vmul.f32 %v1530_v1, %v694_v18  ;;  %v701_v23 = vmul.f32 %v1532_v20, %v680_v6  ;;  %vm707_vm7 = vweird.f32 %v1532_v20 }
 0x2b2   : > { %1533 = vrsqrt.f32 %v681_v21  ;;  %v632_v24 = vmul.f32 %v2086_v4, %v2086_v4  ;;  %vm708_vm9 = vmor %vm706_vm8, %vm707_vm7  ;;  %vm716_vm11 = vweird.f32 %v681_v21 }
 0x2b3   : > { %v699_v27 = vsel %vm698_vm6, %v1530_v1, %v695_v11  ;;  %v702_v38 = vmul.f32 %v1532_v20, %v701_v23 }
 0x2b4   : > { %v659_v30 = vsel %vm561_vm2, %v632_v24, 0.0  ;;  %v800_v31 = vmul.f32 %v699_v27, %v1994_v7 }
 0x2b5   : > { %v703_v63 = vmul.f32 0.5, %v702_v38  ;;  %666 = vadd.xlane.f32.xlu1 %v665_v29  ;;  %660 = vadd.xlane.f32.xlu0 %v659_v30  ;;  %v646_v33 = vpop.xlane.xlu0 %645 }
 0x2b6   : > { %v671_v35 = vmul.f32 %v646_v33, %v1991_v3  ;;  %v812_v56 = vmul.f32 %v2095_v60, %v800_v31 }
 0x2b7   : > { %v704_v41 = vsub.f32 1.5, %v703_v63 }
 0x2b8   : > { %v1534_v42 = vpop.eup %1533  ;;  %v682_v40 = vadd.f32 1e-05, %v671_v35  ;;  %v824_v43 = vadd.f32 %v2103_v32, %v812_v56 }
 0x2b9   : > { %v705_v7 = vmul.f32 %v1532_v20, %v704_v41  ;;  %v711_v46 = vmul.f32 %v1534_v42, %v681_v21  ;;  %vm717_vm10 = vweird.f32 %v1534_v42 }
 0x2ba   : > { %1535 = vrsqrt.f32 %v682_v40  ;;  %v835_v47 = vmax.f32 %v824_v43, 0.0  ;;  %vm718_vm12 = vmor %vm716_vm11, %vm717_vm10  ;;  %vm726_vm14 = vweird.f32 %v682_v40 }
 0x2bb   : > { %v709_v17 = vsel %vm708_vm9, %v1532_v20, %v705_v7  ;;  %v712_v19 = vmul.f32 %v1534_v42, %v711_v46 }
 0x2bc   : > { %1397 = vmatmul.msk.f32.vlgmr.msra.gmra.mxu1 %vm561_vm2, %v835_v47  ;;  %v801_v50 = vmul.f32 %v709_v17, %v2000_v26 }
 0x2bd   : > { %v713_v51 = vmul.f32 0.5, %v712_v19  ;;  %v649_v49 = vpop.xlane.xlu1 %648 }
 0x2be   : > { %v672_v54 = vmul.f32 %v649_v49, %v1991_v3  ;;  %v813_v55 = vmul.f32 %v2095_v60, %v801_v50 }
 0x2bf   : > { %v714_v57 = vsub.f32 1.5, %v713_v51 }
 0x2c0   : > { %v1536_v34 = vpop.eup %1535  ;;  %v683_v58 = vadd.f32 1e-05, %v672_v54  ;;  %v825_v53 = vadd.f32 %v2103_v32, %v813_v55 }
 0x2c1   : > { %v715_v61 = vmul.f32 %v1534_v42, %v714_v57  ;;  %v721_v62 = vmul.f32 %v1536_v34, %v682_v40  ;;  %vm727_vm13 = vweird.f32 %v1536_v34 }
 0x2c2   : > { %1537 = vrsqrt.f32 %v683_v58  ;;  %v836_v0 = vmax.f32 %v825_v53, 0.0  ;;  %vm728_vm15 = vmor %vm726_vm14, %vm727_vm13  ;;  %vm736_vm1 = vweird.f32 %v683_v58 }
 0x2c3   : > { %v719_v25 = vsel %vm718_vm12, %v1534_v42, %v715_v61  ;;  %v722_v26 = vmul.f32 %v1536_v34, %v721_v62 }
 0x2c4   : > { %1398 = vmatmul.msk.f32.gmra.mxu1 %vm561_vm2, %v836_v0  ;;  %v802_v48 = vmul.f32 %v719_v25, %v2008_v16 }
 0x2c5   : > { %v723_v1 = vmul.f32 0.5, %v722_v26  ;;  %v652_v2 = vpop.xlane.xlu2 %651 }
 0x2c6   : > { %v673_v6 = vmul.f32 %v652_v2, %v1991_v3  ;;  %v814_v8 = vmul.f32 %v2095_v60, %v802_v48 }
 0x2c7   : > { %v724_v36 = vsub.f32 1.5, %v723_v1 }
 0x2c8   : > { %v1538_v9 = vpop.eup %1537  ;;  %v684_v44 = vadd.f32 1e-05, %v673_v6  ;;  %v826_v12 = vadd.f32 %v2103_v32, %v814_v8 }
 0x2c9   : > { %v725_v13 = vmul.f32 %v1536_v34, %v724_v36  ;;  %v731_v14 = vmul.f32 %v1538_v9, %v683_v58  ;;  %vm737_vm0 = vweird.f32 %v1538_v9 }
 0x2ca   : > { %1539 = vrsqrt.f32 %v684_v44  ;;  %v837_v15 = vmax.f32 %v826_v12, 0.0  ;;  %vm738_vm3 = vmor %vm736_vm1, %vm737_vm0  ;;  %vm746_vm5 = vweird.f32 %v684_v44  ;;  %vm938_vm0 = vcmask 261120  }
 0x2cb   : > { %v729_v37 = vsel %vm728_vm15, %v1536_v34, %v725_v13  ;;  %v732_v16 = vmul.f32 %v1538_v9, %v731_v14 }
 0x2cc   : > { %1399 = vmatmul.msk.f32.gmra.mxu1 %vm561_vm2, %v837_v15  ;;  %v803_v18 = vmul.f32 %v729_v37, %v2016_v22 }
 0x2cd   : > { %v733_v20 = vmul.f32 0.5, %v732_v16  ;;  %v655_v21 = vpop.xlane.xlu0 %654 }
 0x2ce   : > { %v674_v59 = vmul.f32 %v655_v21, %v1991_v3  ;;  %v815_v11 = vmul.f32 %v2095_v60, %v803_v18 }
 0x2cf   : > { %v734_v23 = vsub.f32 1.5, %v733_v20 }
 0x2d0   : > { %v1540_v24 = vpop.eup %1539  ;;  %v685_v27 = vadd.f32 1e-05, %v674_v59  ;;  %v827_v38 = vadd.f32 %v2103_v32, %v815_v11 }
 0x2d1   : > { %v735_v29 = vmul.f32 %v1538_v9, %v734_v23  ;;  %v741_v30 = vmul.f32 %v1540_v24, %v684_v44  ;;  %vm747_vm4 = vweird.f32 %v1540_v24 }
 0x2d2   : > { %1541 = vrsqrt.f32 %v685_v27  ;;  %v838_v31 = vmax.f32 %v827_v38, 0.0  ;;  %vm748_vm6 = vmor %vm746_vm5, %vm747_vm4  ;;  %vm756_vm8 = vweird.f32 %v685_v27 }
 0x2d3   : > { %v739_v63 = vsel %vm738_vm3, %v1538_v9, %v735_v29  ;;  %v742_v22 = vmul.f32 %v1540_v24, %v741_v30 }
 0x2d4   : > { %1400 = vmatmul.msk.f32.gmra.mxu1 %vm561_vm2, %v838_v31  ;;  %v804_v33 = vmul.f32 %v739_v63, %v2022_v28 }
 0x2d5   : > { %v743_v35 = vmul.f32 0.5, %v742_v22  ;;  %v664_v56 = vpop.xlane.xlu2 %663 }
 0x2d6   : > { %v677_v41 = vmul.f32 %v664_v56, %v1991_v3  ;;  %v816_v42 = vmul.f32 %v2095_v60, %v804_v33 }
 0x2d7   : > { %v744_v40 = vsub.f32 1.5, %v743_v35 }
 0x2d8   : > { %v1542_v43 = vpop.eup %1541  ;;  %v688_v7 = vadd.f32 1e-05, %v677_v41  ;;  %v828_v46 = vadd.f32 %v2103_v32, %v816_v42 }
 0x2d9   : > { %v745_v47 = vmul.f32 %v1540_v24, %v744_v40  ;;  %v751_v17 = vmul.f32 %v1542_v43, %v685_v27  ;;  %vm757_vm7 = vweird.f32 %v1542_v43 }
 0x2da   : > { %1543 = vrsqrt.f32 %v688_v7  ;;  %v839_v19 = vmax.f32 %v828_v46, 0.0  ;;  %vm758_vm9 = vmor %vm756_vm8, %vm757_vm7  ;;  %vm786_vm11 = vweird.f32 %v688_v7 }
 0x2db   : > { %v749_v50 = vsel %vm748_vm6, %v1540_v24, %v745_v47  ;;  %v752_v28 = vmul.f32 %v1542_v43, %v751_v17 }
 0x2dc   : > { %1401 = vmatmul.msk.f32.gmra.mxu1 %vm561_vm2, %v839_v19  ;;  %v805_v51 = vmul.f32 %v749_v50, %v2028_v52 }
 0x2dd   : > { %v753_v49 = vmul.f32 0.5, %v752_v28 }
 0x2de   : > { %v817_v54 = vmul.f32 %v2095_v60, %v805_v51 }
 0x2df   : > { %v754_v55 = vsub.f32 1.5, %v753_v49 }
 0x2e0   : > { %v1544_v57 = vpop.eup %1543  ;;  %v829_v34 = vadd.f32 %v2103_v32, %v817_v54 }
 0x2e1   : > { %v755_v58 = vmul.f32 %v1542_v43, %v754_v55  ;;  %v781_v53 = vmul.f32 %v1544_v57, %v688_v7  ;;  %vm787_vm10 = vweird.f32 %v1544_v57 }
 0x2e2   : > { %v840_v61 = vmax.f32 %v829_v34, 0.0  ;;  %vm788_vm12 = vmor %vm786_vm11, %vm787_vm10 }
 0x2e3   : > { %v759_v62 = vsel %vm758_vm9, %v1542_v43, %v755_v58  ;;  %v782_v0 = vmul.f32 %v1544_v57, %v781_v53 }
 0x2e4   : > { %1402 = vmatmul.msk.f32.gmra.mxu1 %vm561_vm2, %v840_v61  ;;  %v806_v25 = vmul.f32 %v759_v62, %v2034_v39 }
 0x2e5   : > { %v783_v52 = vmul.f32 0.5, %v782_v0 }
 0x2e6   : > { %v818_v26 = vmul.f32 %v2095_v60, %v806_v25 }
 0x2e7   : > { %v784_v48 = vsub.f32 1.5, %v783_v52 }
 0x2e8   : > { %v830_v1 = vadd.f32 %v2103_v32, %v818_v26 }
 0x2e9   : > { %v785_v2 = vmul.f32 %v1544_v57, %v784_v48 }
 0x2ea   : > { %v841_v6 = vmax.f32 %v830_v1, 0.0 }
 0x2eb   : > { %v789_v8 = vsel %vm788_vm12, %v1544_v57, %v785_v2 }
 0x2ec   : > { %v809_v36 = vmul.f32 %v789_v8, %v2041_v45  ;;  %1403 = vmatmul.msk.f32.gmra.mxu1 %vm561_vm2, %v841_v6 }
 0x2ee   : > { %v821_v9 = vmul.f32 %v2095_v60, %v809_v36 }
 0x2f0   : > { %v833_v39 = vadd.f32 %v2103_v32, %v821_v9 }
 0x2f2   : > { %v844_v44 = vmax.f32 %v833_v39, 0.0 }
 0x2f4   : > { %1406 = vmatmul.msk.f32.vlgmr.msrb.gmra.mxu3 %vm561_vm2, %v844_v44 }
 0x320   : > { %v658_v12 = vpop.xlane.xlu1 %657 }
 0x321   : > { %v675_v13 = vmul.f32 %v658_v12, %v1991_v3  ;;  %v1645_v12 = vmov 32.0  }
 0x323   : > { %v686_v14 = vadd.f32 1e-05, %v675_v13 }
 0x325   : > { %1545 = vrsqrt.f32 %v686_v14  ;;  %vm766_vm14 = vweird.f32 %v686_v14 }
 0x328   : > { %v667_v15 = vpop.xlane.xlu1 %666  ;;  %v661_v37 = vpop.xlane.xlu0 %660 }
 0x329   : > { %v678_v16 = vmul.f32 %v667_v15, %v1991_v3  ;;  %v676_v45 = vmul.f32 %v661_v37, %v1991_v3  ;;  %v2147_v3 = vld [vmem:[%s2414_s4 + $0x3] ss:$0 sm:$0xff] }
 0x32b   : > { %v1546_v18 = vpop.eup %1545  ;;  %v689_v20 = vadd.f32 1e-05, %v678_v16  ;;  %v687_v21 = vadd.f32 1e-05, %v676_v45 }
 0x32c   : > { %v761_v59 = vmul.f32 %v1546_v18, %v686_v14  ;;  %vm767_vm13 = vweird.f32 %v1546_v18 }
 0x32d   : > { %1547 = vrsqrt.f32 %v689_v20  ;;  %vm768_vm15 = vmor %vm766_vm14, %vm767_vm13  ;;  %vm796_vm4 = vweird.f32 %v689_v20  ;;  %vm776_vm6 = vweird.f32 %v687_v21 }
 0x32e   : > { %v762_v11 = vmul.f32 %v1546_v18, %v761_v59  ;;  %1549 = vrsqrt.f32 %v687_v21 }
 0x32f   : > { %1551 = vrcp.f32 %v1645_v12 }
 0x330   : > { %v763_v23 = vmul.f32 0.5, %v762_v11 }
 0x332   : > { %v764_v24 = vsub.f32 1.5, %v763_v23 }
 0x333   : > { %v1548_v27 = vpop.eup %1547 }
 0x334   : > { %v1550_v38 = vpop.eup %1549  ;;  %v765_v29 = vmul.f32 %v1546_v18, %v764_v24  ;;  %v791_v30 = vmul.f32 %v1548_v27, %v689_v20  ;;  %vm797_vm1 = vweird.f32 %v1548_v27 }
 0x335   : > { %v771_v31 = vmul.f32 %v1550_v38, %v687_v21  ;;  %vm777_vm3 = vweird.f32 %v1550_v38  ;;  %vm798_vm5 = vmor %vm796_vm4, %vm797_vm1  ;;  %v1552_v13 = vpop.eup %1551 }
 0x336   : > { %v769_v63 = vsel %vm768_vm15, %v1546_v18, %v765_v29  ;;  %v792_v22 = vmul.f32 %v1548_v27, %v791_v30  ;;  %vm778_vm7 = vmor %vm776_vm6, %vm777_vm3  ;;  %v973_v14 = vmul.f32 32.0, %v1552_v13 }
 0x337   : > { %v772_v33 = vmul.f32 %v1550_v38, %v771_v31  ;;  %v807_v35 = vmul.f32 %v769_v63, %v2075_v5 }
 0x338   : > { %v793_v56 = vmul.f32 0.5, %v792_v22  ;;  %v974_v15 = vsub.f32 1.0, %v973_v14 }
 0x339   : > { %v773_v41 = vmul.f32 0.5, %v772_v33  ;;  %v905_v42 = vpop.f32.mrf.mxu1  ;;  %v819_v40 = vmul.f32 %v2095_v60, %v807_v35 }
 0x33a   : > { %v794_v43 = vsub.f32 1.5, %v793_v56  ;;  %v906_v7 = vadd.f32 %v2147_v3, %v905_v42  ;;  %v975_v37 = vmul.f32 %v1552_v13, %v974_v15 }
 0x33b   : > { %v774_v46 = vsub.f32 1.5, %v773_v41  ;;  %v831_v47 = vadd.f32 %v2103_v32, %v819_v40 }
 0x33c   : > { %v795_v17 = vmul.f32 %v1548_v27, %v794_v43  ;;  %v939_v19 = vsel %vm938_vm0, %v906_v7, 0.0  ;;  %v976_v16 = vadd.f32 %v1552_v13, %v975_v37 }
 0x33d   : > { %v775_v5 = vmul.f32 %v1550_v38, %v774_v46  ;;  %940 = vadd.xlane.f32.xlu2 %v939_v19  ;;  %v842_v50 = vmax.f32 %v831_v47, 0.0 }
 0x33e   : > { %v799_v28 = vsel %vm798_vm5, %v1548_v27, %v795_v17 }
 0x33f   : > { %v779_v51 = vsel %vm778_vm7, %v1550_v38, %v775_v5  ;;  %1404 = vmatmul.msk.f32.gmra.mxu1 %vm561_vm2, %v842_v50  ;;  %v810_v49 = vmul.f32 %v799_v28, %v2080_v10 }
 0x340   : > { %v808_v54 = vmul.f32 %v779_v51, %v2086_v4 }
 0x341   : > { %v908_v55 = vpop.f32.mrf.mxu1  ;;  %v822_v57 = vmul.f32 %v2095_v60, %v810_v49 }
 0x342   : > { %v909_v34 = vadd.f32 %v2147_v3, %v908_v55  ;;  %v820_v58 = vmul.f32 %v2095_v60, %v808_v54 }
 0x343   : > { %v834_v53 = vadd.f32 %v2103_v32, %v822_v57 }
 0x344   : > { %v942_v61 = vsel %vm938_vm0, %v909_v34, 0.0  ;;  %v832_v62 = vadd.f32 %v2103_v32, %v820_v58 }
 0x345   : > { %943 = vadd.xlane.f32.xlu0 %v942_v61  ;;  %v845_v0 = vmax.f32 %v834_v53, 0.0 }
 0x346   : > { %v843_v25 = vmax.f32 %v832_v62, 0.0 }
 0x347   : > { %1407 = vmatmul.msk.f32.gmra.mxu3 %vm561_vm2, %v845_v0 }
 0x348   : > { %1405 = vmatmul.msk.f32.gmra.mxu1 %vm561_vm2, %v843_v25  ;;  %vm977_vm2 = vweird.f32 %v1552_v13 }
 0x349   : > { %v911_v10 = vpop.f32.mrf.mxu1  ;;  %v2181_v45 = vsel %vm977_vm2, %v1552_v13, %v976_v16 }
 0x34a   : > { %v912_v4 = vadd.f32 %v2147_v3, %v911_v10 }
 0x34c   : > { %v945_v52 = vsel %vm938_vm0, %v912_v4, 0.0 }
 0x34d   : > { %946 = vadd.xlane.f32.xlu1 %v945_v52 }
 0x351   : > { %v914_v60 = vpop.f32.mrf.mxu1 }
 0x352   : > { %v915_v26 = vadd.f32 %v2147_v3, %v914_v60 }
 0x354   : > { %v948_v48 = vsel %vm938_vm0, %v915_v26, 0.0 }
 0x355   : > { %949 = vadd.xlane.f32.xlu2 %v948_v48  ;;  %v1226_v48 = vld [vmem:[%s2413_s3 + $0x18] sm:$0xff] }
 0x356   : > { %1273 = vmatpush.msra.mxu2 %v1226_v48  ;;  %1446 = vmatpush.msra.mxu3 %v1226_v48 }
 0x359   : > { %v917_v32 = vpop.f32.mrf.mxu1 }
 0x35a   : > { %v918_v1 = vadd.f32 %v2147_v3, %v917_v32  ;;  %v1225_v32 = vld [vmem:[%s2413_s3 + $0x10] sm:$0xff] }
 0x35b   : > { %1274 = vmatpush.msra.mxu2 %v1225_v32  ;;  %1447 = vmatpush.msra.mxu3 %v1225_v32 }
 0x35c   : > { %v951_v2 = vsel %vm938_vm0, %v918_v1, 0.0 }
 0x35d   : > { %952 = vadd.xlane.f32.xlu0 %v951_v2 }
 0x361   : > { %v920_v6 = vpop.f32.mrf.mxu1 }
 0x362   : > { %v2172_v8 = vadd.f32 %v2147_v3, %v920_v6  ;;  %v1223_v6 = vld [vmem:[%s2413_s3] sm:$0xff] }
 0x364   : > { %v954_v36 = vsel %vm938_vm0, %v2172_v8, 0.0 }
 0x365   : > { %955 = vadd.xlane.f32.xlu1 %v954_v36 }
 0x369   : > { %v923_v9 = vpop.f32.mrf.mxu1 }
 0x36a   : > { %v2177_v39 = vadd.f32 %v2147_v3, %v923_v9 }
 0x36c   : > { %v957_v44 = vsel %vm938_vm0, %v2177_v39, 0.0 }
 0x36d   : > { %958 = vadd.xlane.f32.xlu0 %v957_v44 }
 0x377   : > { %v932_v35 = vpop.f32.mrf.mxu3 }
 0x378   : > { %v2213_v19 = vadd.f32 %v2147_v3, %v932_v35  ;;  %v2276_v35 = vld [vmem:[%s2414_s4 + $0x4] ss:$0 sm:$0xff] }
 0x37a   : > { %v966_v49 = vsel %vm938_vm0, %v2213_v19, 0.0 }
 0x3b0   : > { %v941_v18 = vpop.xlane.xlu2 %940 }
 0x3b1   : > { %v979_v20 = vmul.f32 %v2181_v45, %v941_v18 }
 0x3b3   : > { %v2184_v21 = vsub.f32 %v906_v7, %v979_v20 }
 0x3b5   : > { %v1001_v59 = vmul.f32 %v2184_v21, %v2184_v21 }
 0x3b7   : > { %v1012_v11 = vsel %vm938_vm0, %v1001_v59, 0.0 }
 0x3b8   : > { %1013 = vadd.xlane.f32.xlu2 %v1012_v11  ;;  %v944_v23 = vpop.xlane.xlu0 %943 }
 0x3b9   : > { %v980_v24 = vmul.f32 %v2181_v45, %v944_v23 }
 0x3bb   : > { %v2190_v27 = vsub.f32 %v909_v34, %v980_v24 }
 0x3bc   : > { %v926_v38 = vpop.f32.mrf.mxu1 }
 0x3bd   : > { %v2193_v29 = vadd.f32 %v2147_v3, %v926_v38  ;;  %v1002_v30 = vmul.f32 %v2190_v27, %v2190_v27 }
 0x3bf   : > { %v960_v31 = vsel %vm938_vm0, %v2193_v29, 0.0  ;;  %v1015_v63 = vsel %vm938_vm0, %v1002_v30, 0.0 }
 0x3c0   : > { %v947_v22 = vpop.xlane.xlu1 %946  ;;  %961 = vadd.xlane.f32.xlu2 %v960_v31  ;;  %1016 = vadd.xlane.f32.xlu1 %v1015_v63 }
 0x3c1   : > { %v981_v33 = vmul.f32 %v2181_v45, %v947_v22 }
 0x3c3   : > { %v2201_v56 = vsub.f32 %v912_v4, %v981_v33 }
 0x3c5   : > { %v929_v41 = vpop.f32.mrf.mxu1  ;;  %v1003_v42 = vmul.f32 %v2201_v56, %v2201_v56 }
 0x3c6   : > { %v2206_v40 = vadd.f32 %v2147_v3, %v929_v41 }
 0x3c7   : > { %v1018_v43 = vsel %vm938_vm0, %v1003_v42, 0.0 }
 0x3c8   : > { %v950_v7 = vpop.xlane.xlu2 %949  ;;  %1019 = vadd.xlane.f32.xlu0 %v1018_v43  ;;  %v963_v46 = vsel %vm938_vm0, %v2206_v40, 0.0 }
 0x3c9   : > { %v982_v47 = vmul.f32 %v2181_v45, %v950_v7  ;;  %964 = vadd.xlane.f32.xlu1 %v963_v46  ;;  %v2284_v46 = vld [vmem:[%s2414_s4 + $0x5] ss:$0 sm:$0xff] }
 0x3ca   : > { %v935_v17 = vpop.f32.mrf.mxu3 }
 0x3cb   : > { %v2215_v5 = vsub.f32 %v915_v26, %v982_v47  ;;  %v2218_v50 = vadd.f32 %v2147_v3, %v935_v17 }
 0x3cd   : > { %v1004_v28 = vmul.f32 %v2215_v5, %v2215_v5  ;;  %v969_v54 = vsel %vm938_vm0, %v2218_v50, 0.0 }
 0x3cf   : > { %v1021_v51 = vsel %vm938_vm0, %v1004_v28, 0.0 }
 0x3d0   : > { %1022 = vadd.xlane.f32.xlu2 %v1021_v51  ;;  %967 = vadd.xlane.f32.xlu0 %v966_v49  ;;  %v953_v55 = vpop.xlane.xlu0 %952 }
 0x3d1   : > { %970 = vadd.xlane.f32.xlu1 %v969_v54  ;;  %v983_v57 = vmul.f32 %v2181_v45, %v953_v55 }
 0x3d3   : > { %v2228_v34 = vsub.f32 %v918_v1, %v983_v57  ;;  %v1224_v1 = vld [vmem:[%s2413_s3 + $0x8] sm:$0xff] }
 0x3d4   : > { %1275 = vmatpush.msra.mxu2 %v1224_v1  ;;  %1448 = vmatpush.msra.mxu3 %v1224_v1 }
 0x3d5   : > { %v1005_v3 = vmul.f32 %v2228_v34, %v2228_v34 }
 0x3d6   : > { %1276 = vmatpush.msra.mxu2 %v1223_v6  ;;  %1449 = vmatpush.msra.mxu3 %v1223_v6 }
 0x3d7   : > { %v1024_v58 = vsel %vm938_vm0, %v1005_v3, 0.0 }
 0x3d8   : > { %v956_v53 = vpop.xlane.xlu1 %955  ;;  %1025 = vadd.xlane.f32.xlu2 %v1024_v58 }
 0x3d9   : > { %v984_v61 = vmul.f32 %v2181_v45, %v956_v53 }
 0x3db   : > { %v2235_v62 = vsub.f32 %v2172_v8, %v984_v61 }
 0x3dd   : > { %v1006_v0 = vmul.f32 %v2235_v62, %v2235_v62 }
 0x3df   : > { %v1027_v25 = vsel %vm938_vm0, %v1006_v0, 0.0 }
 0x3e0   : > { %1028 = vadd.xlane.f32.xlu0 %v1027_v25  ;;  %v959_v10 = vpop.xlane.xlu0 %958 }
 0x3e1   : > { %v985_v4 = vmul.f32 %v2181_v45, %v959_v10 }
 0x3e3   : > { %v2242_v52 = vsub.f32 %v2177_v39, %v985_v4 }
 0x3e5   : > { %v1007_v60 = vmul.f32 %v2242_v52, %v2242_v52 }
 0x3e7   : > { %v1030_v26 = vsel %vm938_vm0, %v1007_v60, 0.0 }
 0x3e8   : > { %1031 = vadd.xlane.f32.xlu1 %v1030_v26 }
 0x42b   : > { %v1014_v2 = vpop.xlane.xlu2 %1013 }
 0x42c   : > { %v1045_v8 = vmul.f32 %v1014_v2, %v2181_v45 }
 0x42e   : > { %v1056_v36 = vadd.f32 1e-05, %v1045_v8 }
 0x430   : > { %1553 = vrsqrt.f32 %v1056_v36  ;;  %vm1073_vm9 = vweird.f32 %v1056_v36 }
 0x433   : > { %v962_v9 = vpop.xlane.xlu2 %961  ;;  %v1017_v39 = vpop.xlane.xlu1 %1016 }
 0x434   : > { %v986_v44 = vmul.f32 %v2181_v45, %v962_v9  ;;  %v1046_v12 = vmul.f32 %v1017_v39, %v2181_v45 }
 0x436   : > { %v1554_v13 = vpop.eup %1553  ;;  %v2263_v14 = vsub.f32 %v2193_v29, %v986_v44  ;;  %v1057_v15 = vadd.f32 1e-05, %v1046_v12 }
 0x437   : > { %v1068_v37 = vmul.f32 %v1554_v13, %v1056_v36  ;;  %vm1074_vm8 = vweird.f32 %v1554_v13 }
 0x438   : > { %1555 = vrsqrt.f32 %v1057_v15  ;;  %v1008_v16 = vmul.f32 %v2263_v14, %v2263_v14  ;;  %vm1075_vm10 = vmor %vm1073_vm9, %vm1074_vm8  ;;  %vm1083_vm12 = vweird.f32 %v1057_v15 }
 0x439   : > { %v1069_v18 = vmul.f32 %v1554_v13, %v1068_v37 }
 0x43a   : > { %v1033_v20 = vsel %vm938_vm0, %v1008_v16, 0.0 }
 0x43b   : > { %v1070_v59 = vmul.f32 0.5, %v1069_v18  ;;  %1034 = vadd.xlane.f32.xlu2 %v1033_v20  ;;  %v1020_v11 = vpop.xlane.xlu0 %1019 }
 0x43c   : > { %v965_v23 = vpop.xlane.xlu1 %964  ;;  %v1047_v24 = vmul.f32 %v1020_v11, %v2181_v45 }
 0x43d   : > { %v1071_v38 = vsub.f32 1.5, %v1070_v59  ;;  %v987_v29 = vmul.f32 %v2181_v45, %v965_v23 }
 0x43e   : > { %v1556_v30 = vpop.eup %1555  ;;  %v1058_v31 = vadd.f32 1e-05, %v1047_v24 }
 0x43f   : > { %v1072_v63 = vmul.f32 %v1554_v13, %v1071_v38  ;;  %v1078_v22 = vmul.f32 %v1556_v30, %v1057_v15  ;;  %v2271_v33 = vsub.f32 %v2206_v40, %v987_v29  ;;  %vm1084_vm11 = vweird.f32 %v1556_v30 }
 0x440   : > { %1557 = vrsqrt.f32 %v1058_v31  ;;  %vm1085_vm13 = vmor %vm1083_vm12, %vm1084_vm11  ;;  %vm1093_vm15 = vweird.f32 %v1058_v31 }
 0x441   : > { %v1076_v41 = vsel %vm1075_vm10, %v1554_v13, %v1072_v63  ;;  %v1079_v42 = vmul.f32 %v1556_v30, %v1078_v22  ;;  %v1009_v43 = vmul.f32 %v2271_v33, %v2271_v33 }
 0x442   : > { %v1177_v7 = vmul.f32 %v1076_v41, %v2184_v21 }
 0x443   : > { %v1080_v40 = vmul.f32 0.5, %v1079_v42  ;;  %v1023_v47 = vpop.xlane.xlu2 %1022  ;;  %v1036_v17 = vsel %vm938_vm0, %v1009_v43, 0.0  ;;  %v968_v28 = vpop.xlane.xlu0 %967 }
 0x444   : > { %v1048_v51 = vmul.f32 %v1023_v47, %v2181_v45  ;;  %1037 = vadd.xlane.f32.xlu0 %v1036_v17  ;;  %v971_v49 = vpop.xlane.xlu1 %970  ;;  %v988_v54 = vmul.f32 %v2181_v45, %v968_v28  ;;  %v1189_v55 = vmul.f32 %v2276_v35, %v1177_v7 }
 0x445   : > { %v1081_v57 = vsub.f32 1.5, %v1080_v40  ;;  %v989_v21 = vmul.f32 %v2181_v45, %v971_v49 }
 0x446   : > { %v1558_v3 = vpop.eup %1557  ;;  %v1059_v58 = vadd.f32 1e-05, %v1048_v51  ;;  %v2292_v53 = vsub.f32 %v2213_v19, %v988_v54  ;;  %v1201_v61 = vadd.f32 %v2284_v46, %v1189_v55 }
 0x447   : > { %v1082_v0 = vmul.f32 %v1556_v30, %v1081_v57  ;;  %v1088_v25 = vmul.f32 %v1558_v3, %v1058_v31  ;;  %v2296_v10 = vsub.f32 %v2218_v50, %v989_v21  ;;  %vm1094_vm14 = vweird.f32 %v1558_v3 }
 0x448   : > { %1559 = vrsqrt.f32 %v1059_v58  ;;  %v1212_v4 = vmax.f32 %v1201_v61, 0.0  ;;  %v1010_v60 = vmul.f32 %v2292_v53, %v2292_v53  ;;  %vm1095_vm1 = vmor %vm1093_vm15, %vm1094_vm14  ;;  %vm1103_vm4 = vweird.f32 %v1059_v58 }
 0x449   : > { %v1086_v26 = vsel %vm1085_vm13, %v1556_v30, %v1082_v0  ;;  %v1089_v48 = vmul.f32 %v1558_v3, %v1088_v25  ;;  %v1011_v19 = vmul.f32 %v2296_v10, %v2296_v10 }
 0x44a   : > { %1408 = vmatmul.msk.f32.vlgmr.msra.gmra.mxu2 %vm938_vm0, %v1212_v4  ;;  %v1039_v32 = vsel %vm938_vm0, %v1010_v60, 0.0  ;;  %v1178_v1 = vmul.f32 %v1086_v26, %v2190_v27 }
 0x44b   : > { %v1090_v2 = vmul.f32 0.5, %v1089_v48  ;;  %v1042_v50 = vsel %vm938_vm0, %v1011_v19, 0.0  ;;  %v1026_v6 = vpop.xlane.xlu2 %1025  ;;  %1040 = vadd.xlane.f32.xlu1 %v1039_v32 }
 0x44c   : > { %1043 = vadd.xlane.f32.xlu2 %v1042_v50  ;;  %v1049_v8 = vmul.f32 %v1026_v6, %v2181_v45  ;;  %v1190_v36 = vmul.f32 %v2276_v35, %v1178_v1 }
 0x44d   : > { %v1091_v9 = vsub.f32 1.5, %v1090_v2 }
 0x44e   : > { %v1560_v39 = vpop.eup %1559  ;;  %v1060_v44 = vadd.f32 1e-05, %v1049_v8  ;;  %v1202_v12 = vadd.f32 %v2284_v46, %v1190_v36 }
 0x44f   : > { %v1092_v13 = vmul.f32 %v1558_v3, %v1091_v9  ;;  %v1098_v15 = vmul.f32 %v1560_v39, %v1059_v58  ;;  %vm1104_vm3 = vweird.f32 %v1560_v39 }
 0x450   : > { %1561 = vrsqrt.f32 %v1060_v44  ;;  %v1213_v27 = vmax.f32 %v1202_v12, 0.0  ;;  %vm1105_vm5 = vmor %vm1103_vm4, %vm1104_vm3  ;;  %vm1113_vm7 = vweird.f32 %v1060_v44 }
 0x451   : > { %v1096_v37 = vsel %vm1095_vm1, %v1558_v3, %v1092_v13  ;;  %v1099_v16 = vmul.f32 %v1560_v39, %v1098_v15 }
 0x452   : > { %1409 = vmatmul.msk.f32.gmra.mxu2 %vm938_vm0, %v1213_v27  ;;  %v1179_v18 = vmul.f32 %v1096_v37, %v2201_v56 }
 0x453   : > { %v1100_v20 = vmul.f32 0.5, %v1099_v16  ;;  %v1029_v59 = vpop.xlane.xlu0 %1028 }
 0x454   : > { %v1050_v11 = vmul.f32 %v1029_v59, %v2181_v45  ;;  %v1191_v23 = vmul.f32 %v2276_v35, %v1179_v18 }
 0x455   : > { %v1101_v24 = vsub.f32 1.5, %v1100_v20 }
 0x456   : > { %v1562_v38 = vpop.eup %1561  ;;  %v1061_v29 = vadd.f32 1e-05, %v1050_v11  ;;  %v1203_v30 = vadd.f32 %v2284_v46, %v1191_v23 }
 0x457   : > { %v1102_v31 = vmul.f32 %v1560_v39, %v1101_v24  ;;  %v1108_v63 = vmul.f32 %v1562_v38, %v1060_v44  ;;  %vm1114_vm6 = vweird.f32 %v1562_v38 }
 0x458   : > { %1563 = vrsqrt.f32 %v1061_v29  ;;  %v1214_v22 = vmax.f32 %v1203_v30, 0.0  ;;  %vm1115_vm2 = vmor %vm1113_vm7, %vm1114_vm6  ;;  %vm1123_vm9 = vweird.f32 %v1061_v29  ;;  %vm1311_vm6 = vcmask 130048  }
 0x459   : > { %v1106_v41 = vsel %vm1105_vm5, %v1560_v39, %v1102_v31  ;;  %v1109_v56 = vmul.f32 %v1562_v38, %v1108_v63 }
 0x45a   : > { %1410 = vmatmul.msk.f32.gmra.mxu2 %vm938_vm0, %v1214_v22  ;;  %v1180_v42 = vmul.f32 %v1106_v41, %v2215_v5 }
 0x45b   : > { %v1110_v43 = vmul.f32 0.5, %v1109_v56  ;;  %v1032_v7 = vpop.xlane.xlu1 %1031 }
 0x45c   : > { %v1051_v40 = vmul.f32 %v1032_v7, %v2181_v45  ;;  %v1192_v47 = vmul.f32 %v2276_v35, %v1180_v42 }
 0x45d   : > { %v1111_v17 = vsub.f32 1.5, %v1110_v43 }
 0x45e   : > { %v1564_v28 = vpop.eup %1563  ;;  %v1062_v51 = vadd.f32 1e-05, %v1051_v40  ;;  %v1204_v49 = vadd.f32 %v2284_v46, %v1192_v47 }
 0x45f   : > { %v1112_v54 = vmul.f32 %v1562_v38, %v1111_v17  ;;  %v1118_v55 = vmul.f32 %v1564_v28, %v1061_v29  ;;  %vm1124_vm8 = vweird.f32 %v1564_v28 }
 0x460   : > { %1565 = vrsqrt.f32 %v1062_v51  ;;  %v1215_v57 = vmax.f32 %v1204_v49, 0.0  ;;  %vm1125_vm10 = vmor %vm1123_vm9, %vm1124_vm8  ;;  %vm1133_vm12 = vweird.f32 %v1062_v51 }
 0x461   : > { %v1116_v21 = vsel %vm1115_vm2, %v1562_v38, %v1112_v54  ;;  %v1119_v5 = vmul.f32 %v1564_v28, %v1118_v55  ;;  %v2344_v54 = vld [vmem:[%s2414_s4 + $0x6] ss:$0 sm:$0xff] }
 0x462   : > { %1411 = vmatmul.msk.f32.gmra.mxu2 %vm938_vm0, %v1215_v57  ;;  %v1181_v3 = vmul.f32 %v1116_v21, %v2228_v34 }
 0x463   : > { %v1120_v58 = vmul.f32 0.5, %v1119_v5 }
 0x464   : > { %v1193_v61 = vmul.f32 %v2276_v35, %v1181_v3 }
 0x465   : > { %v1121_v0 = vsub.f32 1.5, %v1120_v58 }
 0x466   : > { %v1566_v25 = vpop.eup %1565  ;;  %v1205_v4 = vadd.f32 %v2284_v46, %v1193_v61 }
 0x467   : > { %v1122_v60 = vmul.f32 %v1564_v28, %v1121_v0  ;;  %v1128_v26 = vmul.f32 %v1566_v25, %v1062_v51  ;;  %vm1134_vm11 = vweird.f32 %v1566_v25 }
 0x468   : > { %v1216_v48 = vmax.f32 %v1205_v4, 0.0  ;;  %vm1135_vm13 = vmor %vm1133_vm12, %vm1134_vm11 }
 0x469   : > { %v1126_v19 = vsel %vm1125_vm10, %v1564_v28, %v1122_v60  ;;  %v1129_v32 = vmul.f32 %v1566_v25, %v1128_v26 }
 0x46a   : > { %1412 = vmatmul.msk.f32.gmra.mxu2 %vm938_vm0, %v1216_v48  ;;  %v1182_v1 = vmul.f32 %v1126_v19, %v2235_v62 }
 0x46b   : > { %v1130_v34 = vmul.f32 0.5, %v1129_v32 }
 0x46c   : > { %v1194_v2 = vmul.f32 %v2276_v35, %v1182_v1 }
 0x46d   : > { %v1131_v50 = vsub.f32 1.5, %v1130_v34 }
 0x46e   : > { %v1206_v6 = vadd.f32 %v2284_v46, %v1194_v2 }
 0x46f   : > { %v1132_v8 = vmul.f32 %v1566_v25, %v1131_v50 }
 0x470   : > { %v1217_v36 = vmax.f32 %v1206_v6, 0.0 }
 0x471   : > { %v1136_v9 = vsel %vm1135_vm13, %v1566_v25, %v1132_v8 }
 0x472   : > { %1413 = vmatmul.msk.f32.gmra.mxu2 %vm938_vm0, %v1217_v36  ;;  %v1183_v39 = vmul.f32 %v1136_v9, %v2242_v52 }
 0x474   : > { %v1195_v44 = vmul.f32 %v2276_v35, %v1183_v39 }
 0x476   : > { %v1207_v62 = vadd.f32 %v2284_v46, %v1195_v44 }
 0x478   : > { %v1218_v12 = vmax.f32 %v1207_v62, 0.0 }
 0x47a   : > { %1414 = vmatmul.msk.f32.gmra.mxu2 %vm938_vm0, %v1218_v12 }
 0x4ae   : > { %v1035_v13 = vpop.xlane.xlu2 %1034 }
 0x4af   : > { %v1052_v15 = vmul.f32 %v1035_v13, %v2181_v45 }
 0x4b1   : > { %v1063_v27 = vadd.f32 1e-05, %v1052_v15 }
 0x4b3   : > { %1567 = vrsqrt.f32 %v1063_v27  ;;  %vm1143_vm15 = vweird.f32 %v1063_v27 }
 0x4b7   : > { %v1038_v37 = vpop.xlane.xlu0 %1037 }
 0x4b8   : > { %v1053_v16 = vmul.f32 %v1038_v37, %v2181_v45 }
 0x4b9   : > { %v1568_v18 = vpop.eup %1567 }
 0x4ba   : > { %v1138_v20 = vmul.f32 %v1568_v18, %v1063_v27  ;;  %v1064_v59 = vadd.f32 1e-05, %v1053_v16  ;;  %vm1144_vm14 = vweird.f32 %v1568_v18 }
 0x4bb   : > { %vm1145_vm1 = vmor %vm1143_vm15, %vm1144_vm14 }
 0x4bc   : > { %v1139_v52 = vmul.f32 %v1568_v18, %v1138_v20  ;;  %1569 = vrsqrt.f32 %v1064_v59  ;;  %vm1153_vm4 = vweird.f32 %v1064_v59 }
 0x4be   : > { %v1140_v11 = vmul.f32 0.5, %v1139_v52  ;;  %v1041_v23 = vpop.xlane.xlu1 %1040 }
 0x4bf   : > { %v1044_v24 = vpop.xlane.xlu2 %1043  ;;  %v1054_v38 = vmul.f32 %v1041_v23, %v2181_v45 }
 0x4c0   : > { %v1141_v29 = vsub.f32 1.5, %v1140_v11  ;;  %v1055_v30 = vmul.f32 %v1044_v24, %v2181_v45 }
 0x4c1   : > { %v1065_v31 = vadd.f32 1e-05, %v1054_v38 }
 0x4c2   : > { %v1570_v63 = vpop.eup %1569  ;;  %v1142_v22 = vmul.f32 %v1568_v18, %v1141_v29  ;;  %v1066_v41 = vadd.f32 1e-05, %v1055_v30 }
 0x4c3   : > { %v1148_v56 = vmul.f32 %v1570_v63, %v1064_v59  ;;  %1571 = vrsqrt.f32 %v1065_v31  ;;  %vm1154_vm3 = vweird.f32 %v1570_v63  ;;  %vm1163_vm8 = vweird.f32 %v1065_v31 }
 0x4c4   : > { %v1146_v42 = vsel %vm1145_vm1, %v1568_v18, %v1142_v22  ;;  %1573 = vrsqrt.f32 %v1066_v41  ;;  %vm1155_vm5 = vmor %vm1153_vm4, %vm1154_vm3  ;;  %vm1173_vm9 = vweird.f32 %v1066_v41 }
 0x4c5   : > { %v1149_v43 = vmul.f32 %v1570_v63, %v1148_v56  ;;  %v1184_v7 = vmul.f32 %v1146_v42, %v2263_v14 }
 0x4c7   : > { %v1150_v40 = vmul.f32 0.5, %v1149_v43  ;;  %v1196_v47 = vmul.f32 %v2276_v35, %v1184_v7 }
 0x4c9   : > { %v1572_v17 = vpop.eup %1571  ;;  %v1151_v45 = vsub.f32 1.5, %v1150_v40  ;;  %v1208_v28 = vadd.f32 %v2284_v46, %v1196_v47 }
 0x4ca   : > { %v1574_v51 = vpop.eup %1573  ;;  %v1158_v49 = vmul.f32 %v1572_v17, %v1065_v31  ;;  %vm1164_vm7 = vweird.f32 %v1572_v17 }
 0x4cb   : > { %v1152_v55 = vmul.f32 %v1570_v63, %v1151_v45  ;;  %v1168_v14 = vmul.f32 %v1574_v51, %v1066_v41  ;;  %v1219_v57 = vmax.f32 %v1208_v28, 0.0  ;;  %vm1174_vm2 = vweird.f32 %v1574_v51  ;;  %vm1165_vm10 = vmor %vm1163_vm8, %vm1164_vm7 }
 0x4cc   : > { %v1159_v21 = vmul.f32 %v1572_v17, %v1158_v49  ;;  %vm1175_vm11 = vmor %vm1173_vm9, %vm1174_vm2 }
 0x4cd   : > { %v1156_v5 = vsel %vm1155_vm5, %v1570_v63, %v1152_v55  ;;  %v1169_v3 = vmul.f32 %v1574_v51, %v1168_v14  ;;  %v1278_v58 = vpop.f32.mrf.mxu2  ;;  %1415 = vmatmul.msk.f32.gmra.mxu2 %vm938_vm0, %v1219_v57 }
 0x4ce   : > { %v1160_v61 = vmul.f32 0.5, %v1159_v21  ;;  %v1279_v0 = vadd.f32 %v2344_v54, %v1278_v58  ;;  %v1185_v25 = vmul.f32 %v1156_v5, %v2271_v33 }
 0x4cf   : > { %v1170_v4 = vmul.f32 0.5, %v1169_v3 }
 0x4d0   : > { %v1161_v60 = vsub.f32 1.5, %v1160_v61  ;;  %1312 = vst.msk [vmem:[%s2349_s30] sm:$0xff] %vm1311_vm6, %v1279_v0  ;;  %v1197_v26 = vmul.f32 %v2276_v35, %v1185_v25 }
 0x4d1   : > { %v1171_v48 = vsub.f32 1.5, %v1170_v4 }
 0x4d2   : > { %v1162_v19 = vmul.f32 %v1572_v17, %v1161_v60  ;;  %v1209_v32 = vadd.f32 %v2284_v46, %v1197_v26 }
 0x4d3   : > { %v1172_v1 = vmul.f32 %v1574_v51, %v1171_v48 }
 0x4d4   : > { %v1166_v34 = vsel %vm1165_vm10, %v1572_v17, %v1162_v19  ;;  %v1220_v33 = vmax.f32 %v1209_v32, 0.0 }
 0x4d5   : > { %v1176_v2 = vsel %vm1175_vm11, %v1574_v51, %v1172_v1  ;;  %v1281_v50 = vpop.f32.mrf.mxu2  ;;  %v1186_v6 = vmul.f32 %v1166_v34, %v2292_v53 }
 0x4d6   : > { %v1187_v8 = vmul.f32 %v1176_v2, %v2296_v10  ;;  %v1282_v36 = vadd.f32 %v2344_v54, %v1281_v50  ;;  %1416 = vmatmul.msk.f32.gmra.mxu2 %vm938_vm0, %v1220_v33 }
 0x4d7   : > { %v1198_v9 = vmul.f32 %v2276_v35, %v1186_v6 }
 0x4d8   : > { %v1199_v39 = vmul.f32 %v2276_v35, %v1187_v8  ;;  %1313 = vst.msk [vmem:[%s2349_s30 + $0x8] sm:$0xff] %vm1311_vm6, %v1282_v36 }
 0x4d9   : > { %v1210_v44 = vadd.f32 %v2284_v46, %v1198_v9 }
 0x4da   : > { %v1211_v62 = vadd.f32 %v2284_v46, %v1199_v39 }
 0x4db   : > { %v1221_v53 = vmax.f32 %v1210_v44, 0.0 }
 0x4dc   : > { %v1222_v12 = vmax.f32 %v1211_v62, 0.0 }
 0x4dd   : > { %v1284_v10 = vpop.f32.mrf.mxu2 }
 0x4de   : > { %v1285_v13 = vadd.f32 %v2344_v54, %v1284_v10  ;;  %1417 = vmatmul.msk.f32.gmra.mxu2 %vm938_vm0, %v1221_v53  ;;  %1418 = vmatmul.msk.f32.vlgmr.msra.gmra.mxu3 %vm938_vm0, %v1222_v12 }
 0x4e0   : > { %1314 = vst.msk [vmem:[%s2349_s30 + $0x10] sm:$0xff] %vm1311_vm6, %v1285_v13 }
 0x4e5   : > { %v1287_v35 = vpop.f32.mrf.mxu2 }
 0x4e6   : > { %v1288_v15 = vadd.f32 %v2344_v54, %v1287_v35 }
 0x4e8   : > { %1315 = vst.msk [vmem:[%s2349_s30 + $0x18] sm:$0xff] %vm1311_vm6, %v1288_v15 }
 0x4ed   : > { %v1290_v46 = vpop.f32.mrf.mxu2 }
 0x4ee   : > { %v1291_v27 = vadd.f32 %v2344_v54, %v1290_v46 }
 0x4f0   : > { %1316 = vst.msk [vmem:[%s2349_s30 + $0x20] sm:$0xff] %vm1311_vm6, %v1291_v27 }
 0x4f5   : > { %v1293_v37 = vpop.f32.mrf.mxu2 }
 0x4f6   : > { %v1294_v16 = vadd.f32 %v2344_v54, %v1293_v37 }
 0x4f8   : > { %1317 = vst.msk [vmem:[%s2349_s30 + $0x28] sm:$0xff] %vm1311_vm6, %v1294_v16 }
 0x4fd   : > { %v1296_v18 = vpop.f32.mrf.mxu2 }
 0x4fe   : > { %v1297_v20 = vadd.f32 %v2344_v54, %v1296_v18 }
 0x500   : > { %1318 = vst.msk [vmem:[%s2349_s30 + $0x30] sm:$0xff] %vm1311_vm6, %v1297_v20 }
 0x550   : > { %v1299_v59 = vpop.f32.mrf.mxu2 }
 0x551   : > { %v1300_v52 = vadd.f32 %v2344_v54, %v1299_v59 }
 0x553   : > { %1319 = vst.msk [vmem:[%s2349_s30 + $0x38] sm:$0xff] %vm1311_vm6, %v1300_v52 }
 0x559   : > { %v1302_v11 = vpop.f32.mrf.mxu2 }
 0x55a   : > { %v1303_v23 = vadd.f32 %v2344_v54, %v1302_v11 }
 0x55c   : > { %1320 = vst.msk [vmem:[%s2349_s30 + $0x40] sm:$0xff] %vm1311_vm6, %v1303_v23 }
 0x561   : > { %v1305_v24 = vpop.f32.mrf.mxu2  ;;  %v1308_v38 = vpop.f32.mrf.mxu3 }
 0x562   : > { %v1306_v29 = vadd.f32 %v2344_v54, %v1305_v24  ;;  %v1309_v30 = vadd.f32 %v2344_v54, %v1308_v38 }
 0x564   : > { %1321 = vst.msk [vmem:[%s2349_s30 + $0x48] sm:$0xff] %vm1311_vm6, %v1306_v29 }
 0x565   : > { %1322 = vst.msk [vmem:[%s2349_s30 + $0x50] sm:$0xff] %vm1311_vm6, %v1309_v30 }
 0x566 PF: > { %p15_p7 = scmp.ge.s32.totalorder %s1696_s23, 8   ;;  %s2424_s18 = smov %s1631_s19 }
 0x567   : > { %s2425_s19 = smov %s1635_s20  ;;  %s2426_s20 = smov %s1706_s26 }
 0x568   : > { %s2427_s21 = smov %s1696_s23  ;;  %17 = sbr.rel (!%p15_p7) target bundleno = 3 (0x3), region = 80 }
 0x56d   :  { %1345 = vsyncpa [#allocation3], 1 }
 0x56e   :  { %1347 = vsyncpa [#allocation3 + $0x1], 1 }

</bundles_post_ra>
